<compile_context>
chip_gen: v7x
topology: tpu7x:2x2x1
jax: 0.10.0
libtpu: 0.0.40
codegen_flags: <defaults>
</compile_context>

<pallas_src>
import jax
import jax.numpy as jnp
import numpy as np
from jax import lax
from jax.experimental import pallas as pl
from jax.experimental.pallas import tpu as pltpu

# ----------------------------- hyperparameters -----------------------------
N_CLASS = 16      # vocab size
EMB_SIZE = 8      # embedding dim
N_HIDDEN = 32     # LSTM hidden size
NUM_LAYERS = 2    # fixed by the module
BATCH = 2
SEQ_LEN = 8


# ------------------------------- Pallas kernel ------------------------------
def _lstm_lm_kernel(x_ref,        # [T, B, E]   time-major embedded input
                    w0_ref,       # [E+H, 4H]   fused [W_ih0^T ; W_hh0^T]
                    b0_ref,       # [1, 4H]     b_ih0 + b_hh0
                    w1_ref,       # [2H, 4H]    fused [W_ih1^T ; W_hh1^T]
                    b1_ref,       # [1, 4H]     b_ih1 + b_hh1
                    wout_ref,     # [H, C]      output projection W^T
                    bout_ref,     # [1, C]
                    out_ref):     # [B, C]      logits at the last timestep
    T, B, _ = x_ref.shape
    H = wout_ref.shape[0]

    # Hoist invariant loads (and the bias broadcast) out of the unrolled loop —
    # JAX does not CSE broadcast_in_dim inside the loop body.
    w0 = w0_ref[...]
    w1 = w1_ref[...]
    b0 = jnp.broadcast_to(b0_ref[...], (B, 4 * H))
    b1 = jnp.broadcast_to(b1_ref[...], (B, 4 * H))

    def cell(xh, c, w, b):
        # One fused MXU pass per cell: [B, in+H] @ [in+H, 4H].
        gates = jnp.dot(xh, w, preferred_element_type=jnp.float32) + b
        # 32-lane gate slices cost a few XLU selects — negligible at this size.
        i_t = jax.nn.sigmoid(gates[:, 0 * H:1 * H])
        f_t = jax.nn.sigmoid(gates[:, 1 * H:2 * H])
        g_t = jnp.tanh(gates[:, 2 * H:3 * H])
        o_t = jax.nn.sigmoid(gates[:, 3 * H:4 * H])
        c_new = f_t * c + i_t * g_t
        h_new = o_t * jnp.tanh(c_new)
        return h_new, c_new

    zeros = jnp.zeros((B, H), jnp.float32)

    def step(t, carry):
        h0, c0, h1, c1 = carry
        x_t = x_ref[t]                                            # [B, E]
        # layer 0
        h0, c0 = cell(jnp.concatenate([x_t, h0], axis=1), c0, w0, b0)
        # layer 1 (consumes layer-0 output at the same timestep)
        h1, c1 = cell(jnp.concatenate([h0, h1], axis=1), c1, w1, b1)
        return (h0, c0, h1, c1)

    # State carried in vregs; fully unrolled since T is small and static.
    _, _, h1, _ = lax.fori_loop(0, T, step, (zeros, zeros, zeros, zeros),
                                unroll=True)

    # Final projection at the last timestep: outputs.transpose(0,1)[-1] @ W^T + b
    out_ref[...] = (jnp.dot(h1, wout_ref[...],
                            preferred_element_type=jnp.float32)
                    + bout_ref[...])


# --------------------- one-time parameter layout preparation ----------------
def prepare_params(params):
    """Transpose / fuse torch-layout weights once, outside the per-call path."""
    H, C = N_HIDDEN, N_CLASS
    return {
        "emb": params["emb"],                                           # [C, E]
        "w0": jnp.concatenate([params["w_ih0"].T, params["w_hh0"].T], 0),  # [E+H, 4H]
        "b0": (params["b_ih0"] + params["b_hh0"]).reshape(1, 4 * H),
        "w1": jnp.concatenate([params["w_ih1"].T, params["w_hh1"].T], 0),  # [2H, 4H]
        "b1": (params["b_ih1"] + params["b_hh1"]).reshape(1, 4 * H),
        "wout": params["W"].T,                                          # [H, C]
        "bout": params["b"].reshape(1, C),
    }


@jax.jit
def text_lstm_forward(x_ids, prepped):
    """x_ids: int32 [B, T] token indices. Returns logits [B, N_CLASS]."""
    x_emb = prepped["emb"][x_ids]                    # [B, T, E]  (XLA gather)
    x_tbe = jnp.transpose(x_emb, (1, 0, 2))          # [T, B, E]  time-major
    B = x_ids.shape[0]

    vmem = pl.BlockSpec(memory_space=pltpu.MemorySpace.VMEM)
    return pl.pallas_call(
        _lstm_lm_kernel,
        out_shape=jax.ShapeDtypeStruct((B, N_CLASS), jnp.float32),
        in_specs=[vmem] * 7,
        out_specs=vmem,
    )(x_tbe, prepped["w0"], prepped["b0"], prepped["w1"], prepped["b1"],
      prepped["wout"], prepped["bout"])


# ----------------------- deterministic parameter init -----------------------
def init_params(key):
    H, E, C = N_HIDDEN, EMB_SIZE, N_CLASS
    K = 1.0 / np.sqrt(H)
    ks = jax.random.split(key, 10)
    u = lambda k, shape: K * jax.random.uniform(k, shape, dtype=jnp.float32)
    return {
        "emb": jax.random.normal(ks[0], (C, E), dtype=jnp.float32),
        # layer 0 (input E)
        "w_ih0": u(ks[1], (4 * H, E)),
        "w_hh0": u(ks[2], (4 * H, H)),
        "b_ih0": u(ks[3], (4 * H,)),
        "b_hh0": u(ks[4], (4 * H,)),
        # layer 1 (input H, D=1)
        "w_ih1": u(ks[5], (4 * H, H)),
        "w_hh1": u(ks[6], (4 * H, H)),
        "b_ih1": u(ks[7], (4 * H,)),
        "b_hh1": u(ks[8], (4 * H,)),
        # output head
        "W": jax.random.normal(ks[9], (C, H), dtype=jnp.float32) / np.sqrt(H),
        "b": jnp.ones((C,), dtype=jnp.float32),
    }


# ------------------------------ pure-JAX reference ---------------------------
def reference_forward(x_ids, p):
    H = N_HIDDEN
    x = p["emb"][x_ids]                                       # [B, T, E]
    B, T, _ = x.shape

    def layer(inp, wih, whh, bih, bhh):
        def step(carry, x_t):
            h, c = carry
            gates = x_t @ wih.T + h @ whh.T + bih + bhh
            i_t = jax.nn.sigmoid(gates[:, 0 * H:1 * H])
            f_t = jax.nn.sigmoid(gates[:, 1 * H:2 * H])
            g_t = jnp.tanh(gates[:, 2 * H:3 * H])
            o_t = jax.nn.sigmoid(gates[:, 3 * H:4 * H])
            c = f_t * c + i_t * g_t
            h = o_t * jnp.tanh(c)
            return (h, c), h
        h0 = jnp.zeros((B, H), jnp.float32)
        c0 = jnp.zeros((B, H), jnp.float32)
        _, hs = jax.lax.scan(step, (h0, c0), jnp.transpose(inp, (1, 0, 2)))
        return jnp.transpose(hs, (1, 0, 2))                   # [B, T, H]

    out0 = layer(x, p["w_ih0"], p["w_hh0"], p["b_ih0"], p["b_hh0"])
    out1 = layer(out0, p["w_ih1"], p["w_hh1"], p["b_ih1"], p["b_hh1"])
    last = out1[:, -1, :]                                     # [B, H]
    return last @ p["W"].T + p["b"]


if __name__ == "__main__":
    key = jax.random.PRNGKey(0)
    k_param, k_data = jax.random.split(key)
    params = init_params(k_param)
    prepped = prepare_params(params)          # layout conversion done once
    x_ids = jax.random.randint(k_data, (BATCH, SEQ_LEN), 0, N_CLASS,
                               dtype=jnp.int32)

    logits = jax.block_until_ready(text_lstm_forward(x_ids, prepped))

    ref = jax.block_until_ready(reference_forward(x_ids, params))
    np.testing.assert_allclose(np.asarray(logits), np.asarray(ref),
                               rtol=1e-5, atol=1e-5)
    print("KERNEL_OK")
</pallas_src>

<mosaic_0001>
module attributes {stable_mosaic.version = 11 : i64} {
  func.func @_lstm_lm_kernel(%arg0: memref<8x2x8xf32, #tpu.memory_space<vmem>>, %arg1: memref<40x128xf32, #tpu.memory_space<vmem>>, %arg2: memref<1x128xf32, #tpu.memory_space<vmem>>, %arg3: memref<64x128xf32, #tpu.memory_space<vmem>>, %arg4: memref<1x128xf32, #tpu.memory_space<vmem>>, %arg5: memref<32x16xf32, #tpu.memory_space<vmem>>, %arg6: memref<1x16xf32, #tpu.memory_space<vmem>>, %arg7: memref<2x16xf32, #tpu.memory_space<vmem>>) attributes {dimension_semantics = [], scalar_prefetch = 0 : i64, scratch_operands = 0 : i64, tpu.core_type = #tpu.core_type<tc>} {
    %c0 = arith.constant 0 : index
    %c0_0 = arith.constant 0 : index
    %0 = vector.load %arg1[%c0, %c0_0] : memref<40x128xf32, #tpu.memory_space<vmem>>, vector<40x128xf32>
    %c0_1 = arith.constant 0 : index
    %c0_2 = arith.constant 0 : index
    %1 = vector.load %arg3[%c0_1, %c0_2] : memref<64x128xf32, #tpu.memory_space<vmem>>, vector<64x128xf32>
    %c0_3 = arith.constant 0 : index
    %c0_4 = arith.constant 0 : index
    %2 = vector.load %arg2[%c0_3, %c0_4] : memref<1x128xf32, #tpu.memory_space<vmem>>, vector<1x128xf32>
    %3 = vector.shape_cast %2 : vector<1x128xf32> to vector<1x128xf32>
    %4 = vector.broadcast %3 : vector<1x128xf32> to vector<2x128xf32>
    %c0_5 = arith.constant 0 : index
    %c0_6 = arith.constant 0 : index
    %5 = vector.load %arg4[%c0_5, %c0_6] : memref<1x128xf32, #tpu.memory_space<vmem>>, vector<1x128xf32>
    %6 = vector.shape_cast %5 : vector<1x128xf32> to vector<1x128xf32>
    %7 = vector.broadcast %6 : vector<1x128xf32> to vector<2x128xf32>
    %cst = arith.constant 0.000000e+00 : f32
    %8 = vector.broadcast %cst : f32 to vector<2x32xf32>
    %c0_i32 = arith.constant 0 : i32
    %9 = arith.index_cast %c0_i32 : i32 to index
    %c0_7 = arith.constant 0 : index
    %c0_8 = arith.constant 0 : index
    %10 = vector.load %arg0[%9, %c0_7, %c0_8] : memref<8x2x8xf32, #tpu.memory_space<vmem>>, vector<1x2x8xf32>
    %11 = vector.shape_cast %10 : vector<1x2x8xf32> to vector<2x8xf32>
    %12 = tpu.concatenate %11, %8 in 1 : vector<2x8xf32>, vector<2x32xf32> -> vector<2x40xf32>
    %cst_9 = arith.constant dense<0.000000e+00> : vector<2x128xf32>
    %13 = tpu.matmul %12, %0, %cst_9 {dimension_numbers = #tpu.dot_dimension_numbers<[1], [0], [0], [1], [0, 0, 1, 1], [], []>} : vector<2x40xf32>, vector<40x128xf32>, vector<2x128xf32> -> vector<2x128xf32>
    %14 = arith.addf %13, %4 : vector<2x128xf32>
    %15 = vector.extract_strided_slice %14 {offsets = [0, 0], sizes = [2, 32], strides = [1, 1]} : vector<2x128xf32> to vector<2x32xf32>
    %16 = arith.negf %15 : vector<2x32xf32>
    %17 = math.exp %16 : vector<2x32xf32>
    %cst_10 = arith.constant 1.000000e+00 : f32
    %18 = vector.broadcast %cst_10 : f32 to vector<2x32xf32>
    %19 = arith.addf %18, %17 : vector<2x32xf32>
    %20 = arith.divf %18, %19 : vector<2x32xf32>
    %21 = vector.extract_strided_slice %14 {offsets = [0, 32], sizes = [2, 32], strides = [1, 1]} : vector<2x128xf32> to vector<2x32xf32>
    %22 = arith.negf %21 : vector<2x32xf32>
    %23 = math.exp %22 : vector<2x32xf32>
    %cst_11 = arith.constant 1.000000e+00 : f32
    %24 = vector.broadcast %cst_11 : f32 to vector<2x32xf32>
    %25 = arith.addf %24, %23 : vector<2x32xf32>
    %26 = arith.divf %24, %25 : vector<2x32xf32>
    %27 = vector.extract_strided_slice %14 {offsets = [0, 64], sizes = [2, 32], strides = [1, 1]} : vector<2x128xf32> to vector<2x32xf32>
    %28 = math.tanh %27 : vector<2x32xf32>
    %29 = vector.extract_strided_slice %14 {offsets = [0, 96], sizes = [2, 32], strides = [1, 1]} : vector<2x128xf32> to vector<2x32xf32>
    %30 = arith.negf %29 : vector<2x32xf32>
    %31 = math.exp %30 : vector<2x32xf32>
    %cst_12 = arith.constant 1.000000e+00 : f32
    %32 = vector.broadcast %cst_12 : f32 to vector<2x32xf32>
    %33 = arith.addf %32, %31 : vector<2x32xf32>
    %34 = arith.divf %32, %33 : vector<2x32xf32>
    %35 = arith.mulf %26, %8 : vector<2x32xf32>
    %36 = arith.mulf %20, %28 : vector<2x32xf32>
    %37 = arith.addf %35, %36 : vector<2x32xf32>
    %38 = math.tanh %37 : vector<2x32xf32>
    %39 = arith.mulf %34, %38 : vector<2x32xf32>
    %40 = tpu.concatenate %39, %8 in 1 : vector<2x32xf32>, vector<2x32xf32> -> vector<2x64xf32>
    %cst_13 = arith.constant dense<0.000000e+00> : vector<2x128xf32>
    %41 = tpu.matmul %40, %1, %cst_13 {dimension_numbers = #tpu.dot_dimension_numbers<[1], [0], [0], [1], [0, 0, 1, 1], [], []>} : vector<2x64xf32>, vector<64x128xf32>, vector<2x128xf32> -> vector<2x128xf32>
    %42 = arith.addf %41, %7 : vector<2x128xf32>
    %43 = vector.extract_strided_slice %42 {offsets = [0, 0], sizes = [2, 32], strides = [1, 1]} : vector<2x128xf32> to vector<2x32xf32>
    %44 = arith.negf %43 : vector<2x32xf32>
    %45 = math.exp %44 : vector<2x32xf32>
    %cst_14 = arith.constant 1.000000e+00 : f32
    %46 = vector.broadcast %cst_14 : f32 to vector<2x32xf32>
    %47 = arith.addf %46, %45 : vector<2x32xf32>
    %48 = arith.divf %46, %47 : vector<2x32xf32>
    %49 = vector.extract_strided_slice %42 {offsets = [0, 32], sizes = [2, 32], strides = [1, 1]} : vector<2x128xf32> to vector<2x32xf32>
    %50 = arith.negf %49 : vector<2x32xf32>
    %51 = math.exp %50 : vector<2x32xf32>
    %cst_15 = arith.constant 1.000000e+00 : f32
    %52 = vector.broadcast %cst_15 : f32 to vector<2x32xf32>
    %53 = arith.addf %52, %51 : vector<2x32xf32>
    %54 = arith.divf %52, %53 : vector<2x32xf32>
    %55 = vector.extract_strided_slice %42 {offsets = [0, 64], sizes = [2, 32], strides = [1, 1]} : vector<2x128xf32> to vector<2x32xf32>
    %56 = math.tanh %55 : vector<2x32xf32>
    %57 = vector.extract_strided_slice %42 {offsets = [0, 96], sizes = [2, 32], strides = [1, 1]} : vector<2x128xf32> to vector<2x32xf32>
    %58 = arith.negf %57 : vector<2x32xf32>
    %59 = math.exp %58 : vector<2x32xf32>
    %cst_16 = arith.constant 1.000000e+00 : f32
    %60 = vector.broadcast %cst_16 : f32 to vector<2x32xf32>
    %61 = arith.addf %60, %59 : vector<2x32xf32>
    %62 = arith.divf %60, %61 : vector<2x32xf32>
    %63 = arith.mulf %54, %8 : vector<2x32xf32>
    %64 = arith.mulf %48, %56 : vector<2x32xf32>
    %65 = arith.addf %63, %64 : vector<2x32xf32>
    %66 = math.tanh %65 : vector<2x32xf32>
    %67 = arith.mulf %62, %66 : vector<2x32xf32>
    %c1_i32 = arith.constant 1 : i32
    %68 = arith.index_cast %c1_i32 : i32 to index
    %c0_17 = arith.constant 0 : index
    %c0_18 = arith.constant 0 : index
    %69 = vector.load %arg0[%68, %c0_17, %c0_18] : memref<8x2x8xf32, #tpu.memory_space<vmem>>, vector<1x2x8xf32>
    %70 = vector.shape_cast %69 : vector<1x2x8xf32> to vector<2x8xf32>
    %71 = tpu.concatenate %70, %39 in 1 : vector<2x8xf32>, vector<2x32xf32> -> vector<2x40xf32>
    %cst_19 = arith.constant dense<0.000000e+00> : vector<2x128xf32>
    %72 = tpu.matmul %71, %0, %cst_19 {dimension_numbers = #tpu.dot_dimension_numbers<[1], [0], [0], [1], [0, 0, 1, 1], [], []>} : vector<2x40xf32>, vector<40x128xf32>, vector<2x128xf32> -> vector<2x128xf32>
    %73 = arith.addf %72, %4 : vector<2x128xf32>
    %74 = vector.extract_strided_slice %73 {offsets = [0, 0], sizes = [2, 32], strides = [1, 1]} : vector<2x128xf32> to vector<2x32xf32>
    %75 = arith.negf %74 : vector<2x32xf32>
    %76 = math.exp %75 : vector<2x32xf32>
    %cst_20 = arith.constant 1.000000e+00 : f32
    %77 = vector.broadcast %cst_20 : f32 to vector<2x32xf32>
    %78 = arith.addf %77, %76 : vector<2x32xf32>
    %79 = arith.divf %77, %78 : vector<2x32xf32>
    %80 = vector.extract_strided_slice %73 {offsets = [0, 32], sizes = [2, 32], strides = [1, 1]} : vector<2x128xf32> to vector<2x32xf32>
    %81 = arith.negf %80 : vector<2x32xf32>
    %82 = math.exp %81 : vector<2x32xf32>
    %cst_21 = arith.constant 1.000000e+00 : f32
    %83 = vector.broadcast %cst_21 : f32 to vector<2x32xf32>
    %84 = arith.addf %83, %82 : vector<2x32xf32>
    %85 = arith.divf %83, %84 : vector<2x32xf32>
    %86 = vector.extract_strided_slice %73 {offsets = [0, 64], sizes = [2, 32], strides = [1, 1]} : vector<2x128xf32> to vector<2x32xf32>
    %87 = math.tanh %86 : vector<2x32xf32>
    %88 = vector.extract_strided_slice %73 {offsets = [0, 96], sizes = [2, 32], strides = [1, 1]} : vector<2x128xf32> to vector<2x32xf32>
    %89 = arith.negf %88 : vector<2x32xf32>
    %90 = math.exp %89 : vector<2x32xf32>
    %cst_22 = arith.constant 1.000000e+00 : f32
    %91 = vector.broadcast %cst_22 : f32 to vector<2x32xf32>
    %92 = arith.addf %91, %90 : vector<2x32xf32>
    %93 = arith.divf %91, %92 : vector<2x32xf32>
    %94 = arith.mulf %85, %37 : vector<2x32xf32>
    %95 = arith.mulf %79, %87 : vector<2x32xf32>
    %96 = arith.addf %94, %95 : vector<2x32xf32>
    %97 = math.tanh %96 : vector<2x32xf32>
    %98 = arith.mulf %93, %97 : vector<2x32xf32>
    %99 = tpu.concatenate %98, %67 in 1 : vector<2x32xf32>, vector<2x32xf32> -> vector<2x64xf32>
    %cst_23 = arith.constant dense<0.000000e+00> : vector<2x128xf32>
    %100 = tpu.matmul %99, %1, %cst_23 {dimension_numbers = #tpu.dot_dimension_numbers<[1], [0], [0], [1], [0, 0, 1, 1], [], []>} : vector<2x64xf32>, vector<64x128xf32>, vector<2x128xf32> -> vector<2x128xf32>
    %101 = arith.addf %100, %7 : vector<2x128xf32>
    %102 = vector.extract_strided_slice %101 {offsets = [0, 0], sizes = [2, 32], strides = [1, 1]} : vector<2x128xf32> to vector<2x32xf32>
    %103 = arith.negf %102 : vector<2x32xf32>
    %104 = math.exp %103 : vector<2x32xf32>
    %cst_24 = arith.constant 1.000000e+00 : f32
    %105 = vector.broadcast %cst_24 : f32 to vector<2x32xf32>
    %106 = arith.addf %105, %104 : vector<2x32xf32>
    %107 = arith.divf %105, %106 : vector<2x32xf32>
    %108 = vector.extract_strided_slice %101 {offsets = [0, 32], sizes = [2, 32], strides = [1, 1]} : vector<2x128xf32> to vector<2x32xf32>
    %109 = arith.negf %108 : vector<2x32xf32>
    %110 = math.exp %109 : vector<2x32xf32>
    %cst_25 = arith.constant 1.000000e+00 : f32
    %111 = vector.broadcast %cst_25 : f32 to vector<2x32xf32>
    %112 = arith.addf %111, %110 : vector<2x32xf32>
    %113 = arith.divf %111, %112 : vector<2x32xf32>
    %114 = vector.extract_strided_slice %101 {offsets = [0, 64], sizes = [2, 32], strides = [1, 1]} : vector<2x128xf32> to vector<2x32xf32>
    %115 = math.tanh %114 : vector<2x32xf32>
    %116 = vector.extract_strided_slice %101 {offsets = [0, 96], sizes = [2, 32], strides = [1, 1]} : vector<2x128xf32> to vector<2x32xf32>
    %117 = arith.negf %116 : vector<2x32xf32>
    %118 = math.exp %117 : vector<2x32xf32>
    %cst_26 = arith.constant 1.000000e+00 : f32
    %119 = vector.broadcast %cst_26 : f32 to vector<2x32xf32>
    %120 = arith.addf %119, %118 : vector<2x32xf32>
    %121 = arith.divf %119, %120 : vector<2x32xf32>
    %122 = arith.mulf %113, %65 : vector<2x32xf32>
    %123 = arith.mulf %107, %115 : vector<2x32xf32>
    %124 = arith.addf %122, %123 : vector<2x32xf32>
    %125 = math.tanh %124 : vector<2x32xf32>
    %126 = arith.mulf %121, %125 : vector<2x32xf32>
    %c2_i32 = arith.constant 2 : i32
    %127 = arith.index_cast %c2_i32 : i32 to index
    %c0_27 = arith.constant 0 : index
    %c0_28 = arith.constant 0 : index
    %128 = vector.load %arg0[%127, %c0_27, %c0_28] : memref<8x2x8xf32, #tpu.memory_space<vmem>>, vector<1x2x8xf32>
    %129 = vector.shape_cast %128 : vector<1x2x8xf32> to vector<2x8xf32>
    %130 = tpu.concatenate %129, %98 in 1 : vector<2x8xf32>, vector<2x32xf32> -> vector<2x40xf32>
    %cst_29 = arith.constant dense<0.000000e+00> : vector<2x128xf32>
    %131 = tpu.matmul %130, %0, %cst_29 {dimension_numbers = #tpu.dot_dimension_numbers<[1], [0], [0], [1], [0, 0, 1, 1], [], []>} : vector<2x40xf32>, vector<40x128xf32>, vector<2x128xf32> -> vector<2x128xf32>
    %132 = arith.addf %131, %4 : vector<2x128xf32>
    %133 = vector.extract_strided_slice %132 {offsets = [0, 0], sizes = [2, 32], strides = [1, 1]} : vector<2x128xf32> to vector<2x32xf32>
    %134 = arith.negf %133 : vector<2x32xf32>
    %135 = math.exp %134 : vector<2x32xf32>
    %cst_30 = arith.constant 1.000000e+00 : f32
    %136 = vector.broadcast %cst_30 : f32 to vector<2x32xf32>
    %137 = arith.addf %136, %135 : vector<2x32xf32>
    %138 = arith.divf %136, %137 : vector<2x32xf32>
    %139 = vector.extract_strided_slice %132 {offsets = [0, 32], sizes = [2, 32], strides = [1, 1]} : vector<2x128xf32> to vector<2x32xf32>
    %140 = arith.negf %139 : vector<2x32xf32>
    %141 = math.exp %140 : vector<2x32xf32>
    %cst_31 = arith.constant 1.000000e+00 : f32
    %142 = vector.broadcast %cst_31 : f32 to vector<2x32xf32>
    %143 = arith.addf %142, %141 : vector<2x32xf32>
    %144 = arith.divf %142, %143 : vector<2x32xf32>
    %145 = vector.extract_strided_slice %132 {offsets = [0, 64], sizes = [2, 32], strides = [1, 1]} : vector<2x128xf32> to vector<2x32xf32>
    %146 = math.tanh %145 : vector<2x32xf32>
    %147 = vector.extract_strided_slice %132 {offsets = [0, 96], sizes = [2, 32], strides = [1, 1]} : vector<2x128xf32> to vector<2x32xf32>
    %148 = arith.negf %147 : vector<2x32xf32>
    %149 = math.exp %148 : vector<2x32xf32>
    %cst_32 = arith.constant 1.000000e+00 : f32
    %150 = vector.broadcast %cst_32 : f32 to vector<2x32xf32>
    %151 = arith.addf %150, %149 : vector<2x32xf32>
    %152 = arith.divf %150, %151 : vector<2x32xf32>
    %153 = arith.mulf %144, %96 : vector<2x32xf32>
    %154 = arith.mulf %138, %146 : vector<2x32xf32>
    %155 = arith.addf %153, %154 : vector<2x32xf32>
    %156 = math.tanh %155 : vector<2x32xf32>
    %157 = arith.mulf %152, %156 : vector<2x32xf32>
    %158 = tpu.concatenate %157, %126 in 1 : vector<2x32xf32>, vector<2x32xf32> -> vector<2x64xf32>
    %cst_33 = arith.constant dense<0.000000e+00> : vector<2x128xf32>
    %159 = tpu.matmul %158, %1, %cst_33 {dimension_numbers = #tpu.dot_dimension_numbers<[1], [0], [0], [1], [0, 0, 1, 1], [], []>} : vector<2x64xf32>, vector<64x128xf32>, vector<2x128xf32> -> vector<2x128xf32>
    %160 = arith.addf %159, %7 : vector<2x128xf32>
    %161 = vector.extract_strided_slice %160 {offsets = [0, 0], sizes = [2, 32], strides = [1, 1]} : vector<2x128xf32> to vector<2x32xf32>
    %162 = arith.negf %161 : vector<2x32xf32>
    %163 = math.exp %162 : vector<2x32xf32>
    %cst_34 = arith.constant 1.000000e+00 : f32
    %164 = vector.broadcast %cst_34 : f32 to vector<2x32xf32>
    %165 = arith.addf %164, %163 : vector<2x32xf32>
    %166 = arith.divf %164, %165 : vector<2x32xf32>
    %167 = vector.extract_strided_slice %160 {offsets = [0, 32], sizes = [2, 32], strides = [1, 1]} : vector<2x128xf32> to vector<2x32xf32>
    %168 = arith.negf %167 : vector<2x32xf32>
    %169 = math.exp %168 : vector<2x32xf32>
    %cst_35 = arith.constant 1.000000e+00 : f32
    %170 = vector.broadcast %cst_35 : f32 to vector<2x32xf32>
    %171 = arith.addf %170, %169 : vector<2x32xf32>
    %172 = arith.divf %170, %171 : vector<2x32xf32>
    %173 = vector.extract_strided_slice %160 {offsets = [0, 64], sizes = [2, 32], strides = [1, 1]} : vector<2x128xf32> to vector<2x32xf32>
    %174 = math.tanh %173 : vector<2x32xf32>
    %175 = vector.extract_strided_slice %160 {offsets = [0, 96], sizes = [2, 32], strides = [1, 1]} : vector<2x128xf32> to vector<2x32xf32>
    %176 = arith.negf %175 : vector<2x32xf32>
    %177 = math.exp %176 : vector<2x32xf32>
    %cst_36 = arith.constant 1.000000e+00 : f32
    %178 = vector.broadcast %cst_36 : f32 to vector<2x32xf32>
    %179 = arith.addf %178, %177 : vector<2x32xf32>
    %180 = arith.divf %178, %179 : vector<2x32xf32>
    %181 = arith.mulf %172, %124 : vector<2x32xf32>
    %182 = arith.mulf %166, %174 : vector<2x32xf32>
    %183 = arith.addf %181, %182 : vector<2x32xf32>
    %184 = math.tanh %183 : vector<2x32xf32>
    %185 = arith.mulf %180, %184 : vector<2x32xf32>
    %c3_i32 = arith.constant 3 : i32
    %186 = arith.index_cast %c3_i32 : i32 to index
    %c0_37 = arith.constant 0 : index
    %c0_38 = arith.constant 0 : index
    %187 = vector.load %arg0[%186, %c0_37, %c0_38] : memref<8x2x8xf32, #tpu.memory_space<vmem>>, vector<1x2x8xf32>
    %188 = vector.shape_cast %187 : vector<1x2x8xf32> to vector<2x8xf32>
    %189 = tpu.concatenate %188, %157 in 1 : vector<2x8xf32>, vector<2x32xf32> -> vector<2x40xf32>
    %cst_39 = arith.constant dense<0.000000e+00> : vector<2x128xf32>
    %190 = tpu.matmul %189, %0, %cst_39 {dimension_numbers = #tpu.dot_dimension_numbers<[1], [0], [0], [1], [0, 0, 1, 1], [], []>} : vector<2x40xf32>, vector<40x128xf32>, vector<2x128xf32> -> vector<2x128xf32>
    %191 = arith.addf %190, %4 : vector<2x128xf32>
    %192 = vector.extract_strided_slice %191 {offsets = [0, 0], sizes = [2, 32], strides = [1, 1]} : vector<2x128xf32> to vector<2x32xf32>
    %193 = arith.negf %192 : vector<2x32xf32>
    %194 = math.exp %193 : vector<2x32xf32>
    %cst_40 = arith.constant 1.000000e+00 : f32
    %195 = vector.broadcast %cst_40 : f32 to vector<2x32xf32>
    %196 = arith.addf %195, %194 : vector<2x32xf32>
    %197 = arith.divf %195, %196 : vector<2x32xf32>
    %198 = vector.extract_strided_slice %191 {offsets = [0, 32], sizes = [2, 32], strides = [1, 1]} : vector<2x128xf32> to vector<2x32xf32>
    %199 = arith.negf %198 : vector<2x32xf32>
    %200 = math.exp %199 : vector<2x32xf32>
    %cst_41 = arith.constant 1.000000e+00 : f32
    %201 = vector.broadcast %cst_41 : f32 to vector<2x32xf32>
    %202 = arith.addf %201, %200 : vector<2x32xf32>
    %203 = arith.divf %201, %202 : vector<2x32xf32>
    %204 = vector.extract_strided_slice %191 {offsets = [0, 64], sizes = [2, 32], strides = [1, 1]} : vector<2x128xf32> to vector<2x32xf32>
    %205 = math.tanh %204 : vector<2x32xf32>
    %206 = vector.extract_strided_slice %191 {offsets = [0, 96], sizes = [2, 32], strides = [1, 1]} : vector<2x128xf32> to vector<2x32xf32>
    %207 = arith.negf %206 : vector<2x32xf32>
    %208 = math.exp %207 : vector<2x32xf32>
    %cst_42 = arith.constant 1.000000e+00 : f32
    %209 = vector.broadcast %cst_42 : f32 to vector<2x32xf32>
    %210 = arith.addf %209, %208 : vector<2x32xf32>
    %211 = arith.divf %209, %210 : vector<2x32xf32>
    %212 = arith.mulf %203, %155 : vector<2x32xf32>
    %213 = arith.mulf %197, %205 : vector<2x32xf32>
    %214 = arith.addf %212, %213 : vector<2x32xf32>
    %215 = math.tanh %214 : vector<2x32xf32>
    %216 = arith.mulf %211, %215 : vector<2x32xf32>
    %217 = tpu.concatenate %216, %185 in 1 : vector<2x32xf32>, vector<2x32xf32> -> vector<2x64xf32>
    %cst_43 = arith.constant dense<0.000000e+00> : vector<2x128xf32>
    %218 = tpu.matmul %217, %1, %cst_43 {dimension_numbers = #tpu.dot_dimension_numbers<[1], [0], [0], [1], [0, 0, 1, 1], [], []>} : vector<2x64xf32>, vector<64x128xf32>, vector<2x128xf32> -> vector<2x128xf32>
    %219 = arith.addf %218, %7 : vector<2x128xf32>
    %220 = vector.extract_strided_slice %219 {offsets = [0, 0], sizes = [2, 32], strides = [1, 1]} : vector<2x128xf32> to vector<2x32xf32>
    %221 = arith.negf %220 : vector<2x32xf32>
    %222 = math.exp %221 : vector<2x32xf32>
    %cst_44 = arith.constant 1.000000e+00 : f32
    %223 = vector.broadcast %cst_44 : f32 to vector<2x32xf32>
    %224 = arith.addf %223, %222 : vector<2x32xf32>
    %225 = arith.divf %223, %224 : vector<2x32xf32>
    %226 = vector.extract_strided_slice %219 {offsets = [0, 32], sizes = [2, 32], strides = [1, 1]} : vector<2x128xf32> to vector<2x32xf32>
    %227 = arith.negf %226 : vector<2x32xf32>
    %228 = math.exp %227 : vector<2x32xf32>
    %cst_45 = arith.constant 1.000000e+00 : f32
    %229 = vector.broadcast %cst_45 : f32 to vector<2x32xf32>
    %230 = arith.addf %229, %228 : vector<2x32xf32>
    %231 = arith.divf %229, %230 : vector<2x32xf32>
    %232 = vector.extract_strided_slice %219 {offsets = [0, 64], sizes = [2, 32], strides = [1, 1]} : vector<2x128xf32> to vector<2x32xf32>
    %233 = math.tanh %232 : vector<2x32xf32>
    %234 = vector.extract_strided_slice %219 {offsets = [0, 96], sizes = [2, 32], strides = [1, 1]} : vector<2x128xf32> to vector<2x32xf32>
    %235 = arith.negf %234 : vector<2x32xf32>
    %236 = math.exp %235 : vector<2x32xf32>
    %cst_46 = arith.constant 1.000000e+00 : f32
    %237 = vector.broadcast %cst_46 : f32 to vector<2x32xf32>
    %238 = arith.addf %237, %236 : vector<2x32xf32>
    %239 = arith.divf %237, %238 : vector<2x32xf32>
    %240 = arith.mulf %231, %183 : vector<2x32xf32>
    %241 = arith.mulf %225, %233 : vector<2x32xf32>
    %242 = arith.addf %240, %241 : vector<2x32xf32>
    %243 = math.tanh %242 : vector<2x32xf32>
    %244 = arith.mulf %239, %243 : vector<2x32xf32>
    %c4_i32 = arith.constant 4 : i32
    %245 = arith.index_cast %c4_i32 : i32 to index
    %c0_47 = arith.constant 0 : index
    %c0_48 = arith.constant 0 : index
    %246 = vector.load %arg0[%245, %c0_47, %c0_48] : memref<8x2x8xf32, #tpu.memory_space<vmem>>, vector<1x2x8xf32>
    %247 = vector.shape_cast %246 : vector<1x2x8xf32> to vector<2x8xf32>
    %248 = tpu.concatenate %247, %216 in 1 : vector<2x8xf32>, vector<2x32xf32> -> vector<2x40xf32>
    %cst_49 = arith.constant dense<0.000000e+00> : vector<2x128xf32>
    %249 = tpu.matmul %248, %0, %cst_49 {dimension_numbers = #tpu.dot_dimension_numbers<[1], [0], [0], [1], [0, 0, 1, 1], [], []>} : vector<2x40xf32>, vector<40x128xf32>, vector<2x128xf32> -> vector<2x128xf32>
    %250 = arith.addf %249, %4 : vector<2x128xf32>
    %251 = vector.extract_strided_slice %250 {offsets = [0, 0], sizes = [2, 32], strides = [1, 1]} : vector<2x128xf32> to vector<2x32xf32>
    %252 = arith.negf %251 : vector<2x32xf32>
    %253 = math.exp %252 : vector<2x32xf32>
    %cst_50 = arith.constant 1.000000e+00 : f32
    %254 = vector.broadcast %cst_50 : f32 to vector<2x32xf32>
    %255 = arith.addf %254, %253 : vector<2x32xf32>
    %256 = arith.divf %254, %255 : vector<2x32xf32>
    %257 = vector.extract_strided_slice %250 {offsets = [0, 32], sizes = [2, 32], strides = [1, 1]} : vector<2x128xf32> to vector<2x32xf32>
    %258 = arith.negf %257 : vector<2x32xf32>
    %259 = math.exp %258 : vector<2x32xf32>
    %cst_51 = arith.constant 1.000000e+00 : f32
    %260 = vector.broadcast %cst_51 : f32 to vector<2x32xf32>
    %261 = arith.addf %260, %259 : vector<2x32xf32>
    %262 = arith.divf %260, %261 : vector<2x32xf32>
    %263 = vector.extract_strided_slice %250 {offsets = [0, 64], sizes = [2, 32], strides = [1, 1]} : vector<2x128xf32> to vector<2x32xf32>
    %264 = math.tanh %263 : vector<2x32xf32>
    %265 = vector.extract_strided_slice %250 {offsets = [0, 96], sizes = [2, 32], strides = [1, 1]} : vector<2x128xf32> to vector<2x32xf32>
    %266 = arith.negf %265 : vector<2x32xf32>
    %267 = math.exp %266 : vector<2x32xf32>
    %cst_52 = arith.constant 1.000000e+00 : f32
    %268 = vector.broadcast %cst_52 : f32 to vector<2x32xf32>
    %269 = arith.addf %268, %267 : vector<2x32xf32>
    %270 = arith.divf %268, %269 : vector<2x32xf32>
    %271 = arith.mulf %262, %214 : vector<2x32xf32>
    %272 = arith.mulf %256, %264 : vector<2x32xf32>
    %273 = arith.addf %271, %272 : vector<2x32xf32>
    %274 = math.tanh %273 : vector<2x32xf32>
    %275 = arith.mulf %270, %274 : vector<2x32xf32>
    %276 = tpu.concatenate %275, %244 in 1 : vector<2x32xf32>, vector<2x32xf32> -> vector<2x64xf32>
    %cst_53 = arith.constant dense<0.000000e+00> : vector<2x128xf32>
    %277 = tpu.matmul %276, %1, %cst_53 {dimension_numbers = #tpu.dot_dimension_numbers<[1], [0], [0], [1], [0, 0, 1, 1], [], []>} : vector<2x64xf32>, vector<64x128xf32>, vector<2x128xf32> -> vector<2x128xf32>
    %278 = arith.addf %277, %7 : vector<2x128xf32>
    %279 = vector.extract_strided_slice %278 {offsets = [0, 0], sizes = [2, 32], strides = [1, 1]} : vector<2x128xf32> to vector<2x32xf32>
    %280 = arith.negf %279 : vector<2x32xf32>
    %281 = math.exp %280 : vector<2x32xf32>
    %cst_54 = arith.constant 1.000000e+00 : f32
    %282 = vector.broadcast %cst_54 : f32 to vector<2x32xf32>
    %283 = arith.addf %282, %281 : vector<2x32xf32>
    %284 = arith.divf %282, %283 : vector<2x32xf32>
    %285 = vector.extract_strided_slice %278 {offsets = [0, 32], sizes = [2, 32], strides = [1, 1]} : vector<2x128xf32> to vector<2x32xf32>
    %286 = arith.negf %285 : vector<2x32xf32>
    %287 = math.exp %286 : vector<2x32xf32>
    %cst_55 = arith.constant 1.000000e+00 : f32
    %288 = vector.broadcast %cst_55 : f32 to vector<2x32xf32>
    %289 = arith.addf %288, %287 : vector<2x32xf32>
    %290 = arith.divf %288, %289 : vector<2x32xf32>
    %291 = vector.extract_strided_slice %278 {offsets = [0, 64], sizes = [2, 32], strides = [1, 1]} : vector<2x128xf32> to vector<2x32xf32>
    %292 = math.tanh %291 : vector<2x32xf32>
    %293 = vector.extract_strided_slice %278 {offsets = [0, 96], sizes = [2, 32], strides = [1, 1]} : vector<2x128xf32> to vector<2x32xf32>
    %294 = arith.negf %293 : vector<2x32xf32>
    %295 = math.exp %294 : vector<2x32xf32>
    %cst_56 = arith.constant 1.000000e+00 : f32
    %296 = vector.broadcast %cst_56 : f32 to vector<2x32xf32>
    %297 = arith.addf %296, %295 : vector<2x32xf32>
    %298 = arith.divf %296, %297 : vector<2x32xf32>
    %299 = arith.mulf %290, %242 : vector<2x32xf32>
    %300 = arith.mulf %284, %292 : vector<2x32xf32>
    %301 = arith.addf %299, %300 : vector<2x32xf32>
    %302 = math.tanh %301 : vector<2x32xf32>
    %303 = arith.mulf %298, %302 : vector<2x32xf32>
    %c5_i32 = arith.constant 5 : i32
    %304 = arith.index_cast %c5_i32 : i32 to index
    %c0_57 = arith.constant 0 : index
    %c0_58 = arith.constant 0 : index
    %305 = vector.load %arg0[%304, %c0_57, %c0_58] : memref<8x2x8xf32, #tpu.memory_space<vmem>>, vector<1x2x8xf32>
    %306 = vector.shape_cast %305 : vector<1x2x8xf32> to vector<2x8xf32>
    %307 = tpu.concatenate %306, %275 in 1 : vector<2x8xf32>, vector<2x32xf32> -> vector<2x40xf32>
    %cst_59 = arith.constant dense<0.000000e+00> : vector<2x128xf32>
    %308 = tpu.matmul %307, %0, %cst_59 {dimension_numbers = #tpu.dot_dimension_numbers<[1], [0], [0], [1], [0, 0, 1, 1], [], []>} : vector<2x40xf32>, vector<40x128xf32>, vector<2x128xf32> -> vector<2x128xf32>
    %309 = arith.addf %308, %4 : vector<2x128xf32>
    %310 = vector.extract_strided_slice %309 {offsets = [0, 0], sizes = [2, 32], strides = [1, 1]} : vector<2x128xf32> to vector<2x32xf32>
    %311 = arith.negf %310 : vector<2x32xf32>
    %312 = math.exp %311 : vector<2x32xf32>
    %cst_60 = arith.constant 1.000000e+00 : f32
    %313 = vector.broadcast %cst_60 : f32 to vector<2x32xf32>
    %314 = arith.addf %313, %312 : vector<2x32xf32>
    %315 = arith.divf %313, %314 : vector<2x32xf32>
    %316 = vector.extract_strided_slice %309 {offsets = [0, 32], sizes = [2, 32], strides = [1, 1]} : vector<2x128xf32> to vector<2x32xf32>
    %317 = arith.negf %316 : vector<2x32xf32>
    %318 = math.exp %317 : vector<2x32xf32>
    %cst_61 = arith.constant 1.000000e+00 : f32
    %319 = vector.broadcast %cst_61 : f32 to vector<2x32xf32>
    %320 = arith.addf %319, %318 : vector<2x32xf32>
    %321 = arith.divf %319, %320 : vector<2x32xf32>
    %322 = vector.extract_strided_slice %309 {offsets = [0, 64], sizes = [2, 32], strides = [1, 1]} : vector<2x128xf32> to vector<2x32xf32>
    %323 = math.tanh %322 : vector<2x32xf32>
    %324 = vector.extract_strided_slice %309 {offsets = [0, 96], sizes = [2, 32], strides = [1, 1]} : vector<2x128xf32> to vector<2x32xf32>
    %325 = arith.negf %324 : vector<2x32xf32>
    %326 = math.exp %325 : vector<2x32xf32>
    %cst_62 = arith.constant 1.000000e+00 : f32
    %327 = vector.broadcast %cst_62 : f32 to vector<2x32xf32>
    %328 = arith.addf %327, %326 : vector<2x32xf32>
    %329 = arith.divf %327, %328 : vector<2x32xf32>
    %330 = arith.mulf %321, %273 : vector<2x32xf32>
    %331 = arith.mulf %315, %323 : vector<2x32xf32>
    %332 = arith.addf %330, %331 : vector<2x32xf32>
    %333 = math.tanh %332 : vector<2x32xf32>
    %334 = arith.mulf %329, %333 : vector<2x32xf32>
    %335 = tpu.concatenate %334, %303 in 1 : vector<2x32xf32>, vector<2x32xf32> -> vector<2x64xf32>
    %cst_63 = arith.constant dense<0.000000e+00> : vector<2x128xf32>
    %336 = tpu.matmul %335, %1, %cst_63 {dimension_numbers = #tpu.dot_dimension_numbers<[1], [0], [0], [1], [0, 0, 1, 1], [], []>} : vector<2x64xf32>, vector<64x128xf32>, vector<2x128xf32> -> vector<2x128xf32>
    %337 = arith.addf %336, %7 : vector<2x128xf32>
    %338 = vector.extract_strided_slice %337 {offsets = [0, 0], sizes = [2, 32], strides = [1, 1]} : vector<2x128xf32> to vector<2x32xf32>
    %339 = arith.negf %338 : vector<2x32xf32>
    %340 = math.exp %339 : vector<2x32xf32>
    %cst_64 = arith.constant 1.000000e+00 : f32
    %341 = vector.broadcast %cst_64 : f32 to vector<2x32xf32>
    %342 = arith.addf %341, %340 : vector<2x32xf32>
    %343 = arith.divf %341, %342 : vector<2x32xf32>
    %344 = vector.extract_strided_slice %337 {offsets = [0, 32], sizes = [2, 32], strides = [1, 1]} : vector<2x128xf32> to vector<2x32xf32>
    %345 = arith.negf %344 : vector<2x32xf32>
    %346 = math.exp %345 : vector<2x32xf32>
    %cst_65 = arith.constant 1.000000e+00 : f32
    %347 = vector.broadcast %cst_65 : f32 to vector<2x32xf32>
    %348 = arith.addf %347, %346 : vector<2x32xf32>
    %349 = arith.divf %347, %348 : vector<2x32xf32>
    %350 = vector.extract_strided_slice %337 {offsets = [0, 64], sizes = [2, 32], strides = [1, 1]} : vector<2x128xf32> to vector<2x32xf32>
    %351 = math.tanh %350 : vector<2x32xf32>
    %352 = vector.extract_strided_slice %337 {offsets = [0, 96], sizes = [2, 32], strides = [1, 1]} : vector<2x128xf32> to vector<2x32xf32>
    %353 = arith.negf %352 : vector<2x32xf32>
    %354 = math.exp %353 : vector<2x32xf32>
    %cst_66 = arith.constant 1.000000e+00 : f32
    %355 = vector.broadcast %cst_66 : f32 to vector<2x32xf32>
    %356 = arith.addf %355, %354 : vector<2x32xf32>
    %357 = arith.divf %355, %356 : vector<2x32xf32>
    %358 = arith.mulf %349, %301 : vector<2x32xf32>
    %359 = arith.mulf %343, %351 : vector<2x32xf32>
    %360 = arith.addf %358, %359 : vector<2x32xf32>
    %361 = math.tanh %360 : vector<2x32xf32>
    %362 = arith.mulf %357, %361 : vector<2x32xf32>
    %c6_i32 = arith.constant 6 : i32
    %363 = arith.index_cast %c6_i32 : i32 to index
    %c0_67 = arith.constant 0 : index
    %c0_68 = arith.constant 0 : index
    %364 = vector.load %arg0[%363, %c0_67, %c0_68] : memref<8x2x8xf32, #tpu.memory_space<vmem>>, vector<1x2x8xf32>
    %365 = vector.shape_cast %364 : vector<1x2x8xf32> to vector<2x8xf32>
    %366 = tpu.concatenate %365, %334 in 1 : vector<2x8xf32>, vector<2x32xf32> -> vector<2x40xf32>
    %cst_69 = arith.constant dense<0.000000e+00> : vector<2x128xf32>
    %367 = tpu.matmul %366, %0, %cst_69 {dimension_numbers = #tpu.dot_dimension_numbers<[1], [0], [0], [1], [0, 0, 1, 1], [], []>} : vector<2x40xf32>, vector<40x128xf32>, vector<2x128xf32> -> vector<2x128xf32>
    %368 = arith.addf %367, %4 : vector<2x128xf32>
    %369 = vector.extract_strided_slice %368 {offsets = [0, 0], sizes = [2, 32], strides = [1, 1]} : vector<2x128xf32> to vector<2x32xf32>
    %370 = arith.negf %369 : vector<2x32xf32>
    %371 = math.exp %370 : vector<2x32xf32>
    %cst_70 = arith.constant 1.000000e+00 : f32
    %372 = vector.broadcast %cst_70 : f32 to vector<2x32xf32>
    %373 = arith.addf %372, %371 : vector<2x32xf32>
    %374 = arith.divf %372, %373 : vector<2x32xf32>
    %375 = vector.extract_strided_slice %368 {offsets = [0, 32], sizes = [2, 32], strides = [1, 1]} : vector<2x128xf32> to vector<2x32xf32>
    %376 = arith.negf %375 : vector<2x32xf32>
    %377 = math.exp %376 : vector<2x32xf32>
    %cst_71 = arith.constant 1.000000e+00 : f32
    %378 = vector.broadcast %cst_71 : f32 to vector<2x32xf32>
    %379 = arith.addf %378, %377 : vector<2x32xf32>
    %380 = arith.divf %378, %379 : vector<2x32xf32>
    %381 = vector.extract_strided_slice %368 {offsets = [0, 64], sizes = [2, 32], strides = [1, 1]} : vector<2x128xf32> to vector<2x32xf32>
    %382 = math.tanh %381 : vector<2x32xf32>
    %383 = vector.extract_strided_slice %368 {offsets = [0, 96], sizes = [2, 32], strides = [1, 1]} : vector<2x128xf32> to vector<2x32xf32>
    %384 = arith.negf %383 : vector<2x32xf32>
    %385 = math.exp %384 : vector<2x32xf32>
    %cst_72 = arith.constant 1.000000e+00 : f32
    %386 = vector.broadcast %cst_72 : f32 to vector<2x32xf32>
    %387 = arith.addf %386, %385 : vector<2x32xf32>
    %388 = arith.divf %386, %387 : vector<2x32xf32>
    %389 = arith.mulf %380, %332 : vector<2x32xf32>
    %390 = arith.mulf %374, %382 : vector<2x32xf32>
    %391 = arith.addf %389, %390 : vector<2x32xf32>
    %392 = math.tanh %391 : vector<2x32xf32>
    %393 = arith.mulf %388, %392 : vector<2x32xf32>
    %394 = tpu.concatenate %393, %362 in 1 : vector<2x32xf32>, vector<2x32xf32> -> vector<2x64xf32>
    %cst_73 = arith.constant dense<0.000000e+00> : vector<2x128xf32>
    %395 = tpu.matmul %394, %1, %cst_73 {dimension_numbers = #tpu.dot_dimension_numbers<[1], [0], [0], [1], [0, 0, 1, 1], [], []>} : vector<2x64xf32>, vector<64x128xf32>, vector<2x128xf32> -> vector<2x128xf32>
    %396 = arith.addf %395, %7 : vector<2x128xf32>
    %397 = vector.extract_strided_slice %396 {offsets = [0, 0], sizes = [2, 32], strides = [1, 1]} : vector<2x128xf32> to vector<2x32xf32>
    %398 = arith.negf %397 : vector<2x32xf32>
    %399 = math.exp %398 : vector<2x32xf32>
    %cst_74 = arith.constant 1.000000e+00 : f32
    %400 = vector.broadcast %cst_74 : f32 to vector<2x32xf32>
    %401 = arith.addf %400, %399 : vector<2x32xf32>
    %402 = arith.divf %400, %401 : vector<2x32xf32>
    %403 = vector.extract_strided_slice %396 {offsets = [0, 32], sizes = [2, 32], strides = [1, 1]} : vector<2x128xf32> to vector<2x32xf32>
    %404 = arith.negf %403 : vector<2x32xf32>
    %405 = math.exp %404 : vector<2x32xf32>
    %cst_75 = arith.constant 1.000000e+00 : f32
    %406 = vector.broadcast %cst_75 : f32 to vector<2x32xf32>
    %407 = arith.addf %406, %405 : vector<2x32xf32>
    %408 = arith.divf %406, %407 : vector<2x32xf32>
    %409 = vector.extract_strided_slice %396 {offsets = [0, 64], sizes = [2, 32], strides = [1, 1]} : vector<2x128xf32> to vector<2x32xf32>
    %410 = math.tanh %409 : vector<2x32xf32>
    %411 = vector.extract_strided_slice %396 {offsets = [0, 96], sizes = [2, 32], strides = [1, 1]} : vector<2x128xf32> to vector<2x32xf32>
    %412 = arith.negf %411 : vector<2x32xf32>
    %413 = math.exp %412 : vector<2x32xf32>
    %cst_76 = arith.constant 1.000000e+00 : f32
    %414 = vector.broadcast %cst_76 : f32 to vector<2x32xf32>
    %415 = arith.addf %414, %413 : vector<2x32xf32>
    %416 = arith.divf %414, %415 : vector<2x32xf32>
    %417 = arith.mulf %408, %360 : vector<2x32xf32>
    %418 = arith.mulf %402, %410 : vector<2x32xf32>
    %419 = arith.addf %417, %418 : vector<2x32xf32>
    %420 = math.tanh %419 : vector<2x32xf32>
    %421 = arith.mulf %416, %420 : vector<2x32xf32>
    %c7_i32 = arith.constant 7 : i32
    %422 = arith.index_cast %c7_i32 : i32 to index
    %c0_77 = arith.constant 0 : index
    %c0_78 = arith.constant 0 : index
    %423 = vector.load %arg0[%422, %c0_77, %c0_78] : memref<8x2x8xf32, #tpu.memory_space<vmem>>, vector<1x2x8xf32>
    %424 = vector.shape_cast %423 : vector<1x2x8xf32> to vector<2x8xf32>
    %425 = tpu.concatenate %424, %393 in 1 : vector<2x8xf32>, vector<2x32xf32> -> vector<2x40xf32>
    %cst_79 = arith.constant dense<0.000000e+00> : vector<2x128xf32>
    %426 = tpu.matmul %425, %0, %cst_79 {dimension_numbers = #tpu.dot_dimension_numbers<[1], [0], [0], [1], [0, 0, 1, 1], [], []>} : vector<2x40xf32>, vector<40x128xf32>, vector<2x128xf32> -> vector<2x128xf32>
    %427 = arith.addf %426, %4 : vector<2x128xf32>
    %428 = vector.extract_strided_slice %427 {offsets = [0, 0], sizes = [2, 32], strides = [1, 1]} : vector<2x128xf32> to vector<2x32xf32>
    %429 = arith.negf %428 : vector<2x32xf32>
    %430 = math.exp %429 : vector<2x32xf32>
    %cst_80 = arith.constant 1.000000e+00 : f32
    %431 = vector.broadcast %cst_80 : f32 to vector<2x32xf32>
    %432 = arith.addf %431, %430 : vector<2x32xf32>
    %433 = arith.divf %431, %432 : vector<2x32xf32>
    %434 = vector.extract_strided_slice %427 {offsets = [0, 32], sizes = [2, 32], strides = [1, 1]} : vector<2x128xf32> to vector<2x32xf32>
    %435 = arith.negf %434 : vector<2x32xf32>
    %436 = math.exp %435 : vector<2x32xf32>
    %cst_81 = arith.constant 1.000000e+00 : f32
    %437 = vector.broadcast %cst_81 : f32 to vector<2x32xf32>
    %438 = arith.addf %437, %436 : vector<2x32xf32>
    %439 = arith.divf %437, %438 : vector<2x32xf32>
    %440 = vector.extract_strided_slice %427 {offsets = [0, 64], sizes = [2, 32], strides = [1, 1]} : vector<2x128xf32> to vector<2x32xf32>
    %441 = math.tanh %440 : vector<2x32xf32>
    %442 = vector.extract_strided_slice %427 {offsets = [0, 96], sizes = [2, 32], strides = [1, 1]} : vector<2x128xf32> to vector<2x32xf32>
    %443 = arith.negf %442 : vector<2x32xf32>
    %444 = math.exp %443 : vector<2x32xf32>
    %cst_82 = arith.constant 1.000000e+00 : f32
    %445 = vector.broadcast %cst_82 : f32 to vector<2x32xf32>
    %446 = arith.addf %445, %444 : vector<2x32xf32>
    %447 = arith.divf %445, %446 : vector<2x32xf32>
    %448 = arith.mulf %439, %391 : vector<2x32xf32>
    %449 = arith.mulf %433, %441 : vector<2x32xf32>
    %450 = arith.addf %448, %449 : vector<2x32xf32>
    %451 = math.tanh %450 : vector<2x32xf32>
    %452 = arith.mulf %447, %451 : vector<2x32xf32>
    %453 = tpu.concatenate %452, %421 in 1 : vector<2x32xf32>, vector<2x32xf32> -> vector<2x64xf32>
    %cst_83 = arith.constant dense<0.000000e+00> : vector<2x128xf32>
    %454 = tpu.matmul %453, %1, %cst_83 {dimension_numbers = #tpu.dot_dimension_numbers<[1], [0], [0], [1], [0, 0, 1, 1], [], []>} : vector<2x64xf32>, vector<64x128xf32>, vector<2x128xf32> -> vector<2x128xf32>
    %455 = arith.addf %454, %7 : vector<2x128xf32>
    %456 = vector.extract_strided_slice %455 {offsets = [0, 0], sizes = [2, 32], strides = [1, 1]} : vector<2x128xf32> to vector<2x32xf32>
    %457 = arith.negf %456 : vector<2x32xf32>
    %458 = math.exp %457 : vector<2x32xf32>
    %cst_84 = arith.constant 1.000000e+00 : f32
    %459 = vector.broadcast %cst_84 : f32 to vector<2x32xf32>
    %460 = arith.addf %459, %458 : vector<2x32xf32>
    %461 = arith.divf %459, %460 : vector<2x32xf32>
    %462 = vector.extract_strided_slice %455 {offsets = [0, 32], sizes = [2, 32], strides = [1, 1]} : vector<2x128xf32> to vector<2x32xf32>
    %463 = arith.negf %462 : vector<2x32xf32>
    %464 = math.exp %463 : vector<2x32xf32>
    %cst_85 = arith.constant 1.000000e+00 : f32
    %465 = vector.broadcast %cst_85 : f32 to vector<2x32xf32>
    %466 = arith.addf %465, %464 : vector<2x32xf32>
    %467 = arith.divf %465, %466 : vector<2x32xf32>
    %468 = vector.extract_strided_slice %455 {offsets = [0, 64], sizes = [2, 32], strides = [1, 1]} : vector<2x128xf32> to vector<2x32xf32>
    %469 = math.tanh %468 : vector<2x32xf32>
    %470 = vector.extract_strided_slice %455 {offsets = [0, 96], sizes = [2, 32], strides = [1, 1]} : vector<2x128xf32> to vector<2x32xf32>
    %471 = arith.negf %470 : vector<2x32xf32>
    %472 = math.exp %471 : vector<2x32xf32>
    %cst_86 = arith.constant 1.000000e+00 : f32
    %473 = vector.broadcast %cst_86 : f32 to vector<2x32xf32>
    %474 = arith.addf %473, %472 : vector<2x32xf32>
    %475 = arith.divf %473, %474 : vector<2x32xf32>
    %476 = arith.mulf %467, %419 : vector<2x32xf32>
    %477 = arith.mulf %461, %469 : vector<2x32xf32>
    %478 = arith.addf %476, %477 : vector<2x32xf32>
    %479 = math.tanh %478 : vector<2x32xf32>
    %480 = arith.mulf %475, %479 : vector<2x32xf32>
    %c8_i32 = arith.constant 8 : i32
    %c0_87 = arith.constant 0 : index
    %c0_88 = arith.constant 0 : index
    %481 = vector.load %arg5[%c0_87, %c0_88] : memref<32x16xf32, #tpu.memory_space<vmem>>, vector<32x16xf32>
    %cst_89 = arith.constant dense<0.000000e+00> : vector<2x16xf32>
    %482 = tpu.matmul %480, %481, %cst_89 {dimension_numbers = #tpu.dot_dimension_numbers<[1], [0], [0], [1], [0, 0, 1, 1], [], []>} : vector<2x32xf32>, vector<32x16xf32>, vector<2x16xf32> -> vector<2x16xf32>
    %c0_90 = arith.constant 0 : index
    %c0_91 = arith.constant 0 : index
    %483 = vector.load %arg6[%c0_90, %c0_91] : memref<1x16xf32, #tpu.memory_space<vmem>>, vector<1x16xf32>
    %484 = vector.broadcast %483 : vector<1x16xf32> to vector<2x16xf32>
    %485 = arith.addf %482, %484 : vector<2x16xf32>
    %c0_92 = arith.constant 0 : index
    %c0_93 = arith.constant 0 : index
    %486 = vector.load %arg7[%c0_92, %c0_93] : memref<2x16xf32, #tpu.memory_space<vmem>>, vector<2x16xf32>
    tpu.vector_store %arg7[%c0_92, %c0_93], %485 {strides = array<i32>} : memref<2x16xf32, #tpu.memory_space<vmem>>, vector<2x16xf32>,
    return
  }
}

</mosaic_0001>

<bundles_post_ra>
// kernel: text_lstm_forward.1
= control target key start
LH: loop header
LB: loop body
LE: loop exit
PB: predicated region body
PF: predicated region fallthrough
CT: control target
= control target key end

     0   :  { %v2568_v3 = vmov 0.0|0.0   ;;  %vm2569_vm0 = vmmov 0   ;;  %v2570_v6 = vmov 0.0   ;;  %s3049_s0 = inlined_call_operand.vmem [shape: f32[8,2,8], index: 0, kind: input, shape index: {}]   ;;  %s3050_s1 = inlined_call_operand.vmem [shape: f32[40,128], index: 1, kind: input, shape index: {}]   ;;  %s3051_s2 = inlined_call_operand.vmem [shape: f32[1,128], index: 2, kind: input, shape index: {}]   ;;  %s3052_s3 = inlined_call_operand.vmem [shape: f32[64,128], index: 3, kind: input, shape index: {}]   ;;  %s3053_s4 = inlined_call_operand.vmem [shape: f32[1,128], index: 4, kind: input, shape index: {}]   ;;  %s3054_s5 = inlined_call_operand.vmem [shape: f32[32,16], index: 5, kind: input, shape index: {}]   ;;  %s3055_s6 = inlined_call_operand.vmem [shape: f32[1,16], index: 6, kind: input, shape index: {}]   ;;  %s3056_s7 = inlined_call_operand.hbm [shape: f32[2,16], index: 7, kind: output, shape index: {}]  }
   0x1   :  { %v27_v0 = vld [vmem:[%s3050_s1] sm:$0xff]  ;;  %v28_v1 = vld [vmem:[%s3050_s1 + $0x8] sm:$0xff]  ;;  %v29_v2 = vld [vmem:[%s3050_s1 + $0x10] sm:$0xff]  ;;  %2259 = vmatprep.subr.bf16.mxu0 %v2568_v3  ;;  %2002 = vmatprep.mubr.msk.f32.mxu0 %vm2569_vm0, %v2570_v6 }
   0x2   :  { %v2625_v4 = vpack.c.bf16 %v28_v1, %v27_v0  ;;  %v30_v5 = vld [vmem:[%s3050_s1 + $0x18] sm:$0xff]  ;;  %2265 = vmatprep.subr.bf16.mxu1 %v2568_v3  ;;  %2021 = vmatprep.mubr.msk.f32.mxu1 %vm2569_vm0, %v2570_v6 }
   0x3   :  { %12 = vsyncpa [#allocation3], 0  ;;  %v2636_v7 = vpack.c.bf16 %v30_v5, %v29_v2  ;;  %v54_v8 = vld [vmem:[%s3049_s0] sm:$0x3]  ;;  %vm55_vm1 = vcmask 64512   ;;  %vm57_vm2 = vcmask 326656  }
   0x4   :  { %2261 = vmatpush3.bf16.msra.mxu0 %v2625_v4  ;;  %v2647_v9 = vld [vmem:[%s3050_s1 + $0x20] sm:$0xff]  ;;  %v56_v10 = vsel %vm55_vm1, %v54_v8, 0.0  ;;  %s2571_s14 = smov 64   ;;  %s2572_s15 = smov 32   ;;  %v33_v26 = vld [vmem:[%s3052_s3 + $0x8] sm:$0xff]  ;;  %v34_v27 = vld [vmem:[%s3052_s3 + $0x10] sm:$0xff] }
   0x5   :  { %2262 = vmatprep.subr.bf16.mxu0 %v2568_v3  ;;  %v2664_v11 = vld [vmem:[%s3051_s2] ss:$0 sm:$0xff]  ;;  %v35_v29 = vld [vmem:[%s3052_s3 + $0x18] sm:$0xff]  ;;  %v37_v32 = vld [vmem:[%s3052_s3 + $0x28] sm:$0xff]  ;;  %s2573_s8 = smov 40   ;;  %vm159_vm3 = vcmask 261120  }
   0x6   :  { %v32_v25 = vld [vmem:[%s3052_s3] sm:$0xff]  ;;  %v2687_v30 = vpack.c.bf16 %v35_v29, %v34_v27  ;;  %v38_v34 = vld [vmem:[%s3052_s3 + $0x30] sm:$0xff]  ;;  %v39_v35 = vld [vmem:[%s3052_s3 + $0x38] sm:$0xff]  ;;  %vm161_vm4 = vcmask 523264   ;;  %vm1808_vm5 = vcmask 123904  }
   0x7   :  { %v2681_v28 = vpack.c.bf16 %v33_v26, %v32_v25  ;;  %v36_v31 = vld [vmem:[%s3052_s3 + $0x20] sm:$0xff]  ;;  %v2708_v37 = vpack.c.bf16 %v39_v35, %v38_v34 }
   0x8   :  { %2264 = vmatpush3.bf16.msra.mxu0 %v2636_v7  ;;  %v2697_v33 = vpack.c.bf16 %v37_v32, %v36_v31  ;;  %v1830_v40 = vld [vmem:[%s3049_s0 + $0x2] sm:$0x3]  ;;  %v2743_v45 = vld [vmem:[%s3053_s4] ss:$0 sm:$0xff] }
   0x9   :  { %2000 = vmatprep.subr.mxu0 %v2570_v6  ;;  %2267 = vmatpush3.bf16.msra.mxu1 %v2681_v28 }
   0xa   :  { %2268 = vmatprep.subr.bf16.mxu1 %v2568_v3 }
   0xc   :  { %2001 = vmatpush3.msra.mxu0 %v2647_v9 }
   0xd   :  { %2003 = vmatmul.mubr.msk.f32.vlgmr.msra.gmra.mrb[0].mxu0 %vm57_vm2, %v56_v10  ;;  %2277 = vmatprep.subr.bf16.mxu0 %v2568_v3 }
   0xe   :  { %2279 = vmatpush3.bf16.msra.mxu0 %v2625_v4  ;;  %2034 = vmatprep.mubr.msk.f32.mxu0 %vm2569_vm0, %v2570_v6 }
   0xf   :  { %2280 = vmatprep.subr.bf16.mxu0 %v2568_v3  ;;  %2270 = vmatpush3.bf16.msra.mxu1 %v2687_v30 }
  0x10   :  { %2271 = vmatprep.subr.bf16.mxu1 %v2568_v3 }
  0x12   :  { %2282 = vmatpush3.bf16.msra.mxu0 %v2636_v7 }
  0x13   :  { %2032 = vmatprep.subr.mxu0 %v2570_v6  ;;  %2273 = vmatpush3.bf16.msra.mxu1 %v2697_v33 }
  0x14   :  { %2274 = vmatprep.subr.bf16.mxu1 %v2568_v3 }
  0x16   :  { %2033 = vmatpush3.msra.mxu0 %v2647_v9 }
  0x17   :  { %2295 = vmatprep.subr.bf16.mxu0 %v2568_v3  ;;  %2276 = vmatpush3.bf16.msra.mxu1 %v2708_v37 }
  0x18   :  { %2283 = vmatprep.subr.bf16.mxu1 %v2568_v3 }
  0xe0   :  { %v127_v12 = vpop.f32.mrb[0].mxu0 }
  0xe1   :  { %v128_v13 = vadd.f32 %v2664_v11, %v127_v12  ;;  %v2004_v14 = vpop.f32.mrb[1].mxu0 }
  0xe3   :  { %2416 = vtanh.f32 %v128_v13  ;;  %v1827_v16 = vmul.f32 -1.442695, %v128_v13 }
  0xe5   :  { %2418 = vpow2.f32 %v1827_v16 }
  0xed   :  { %v2417_v15 = vpop.eup %2416 }
  0xee   :  { %140 = vrot.lane.b32.xlu0 %v2417_v15, %s2571_s14 }
  0xef   :  { %v2419_v17 = vpop.eup %2418 }
  0xf0   :  { %v134_v18 = vadd.f32 1.0, %v2419_v17 }
  0xf2   :  { %2420 = vrcp.f32 %v134_v18 }
  0xfc   :  { %v2421_v19 = vpop.eup %2420 }
  0xfd   :  { %v138_v22 = vmul.f32 0.0, %v2421_v19 }
 0x160   :  { %v141_v20 = vpop.permute.xlu0 %140 }
 0x161   :  { %v143_v21 = vmul.f32 %v2421_v19, %v141_v20 }
 0x163   :  { %145 = vrot.lane.b32.xlu0 %v143_v21, %s2572_s15 }
 0x1d5   :  { %v146_v23 = vpop.permute.xlu0 %145 }
 0x1d6   :  { %v2669_v24 = vadd.f32 %v146_v23, %v138_v22  ;;  %v1835_v23 = vld [vmem:[%s3049_s0 + $0x4] sm:$0x3] }
 0x1d8   :  { %2422 = vtanh.f32 %v2669_v24 }
 0x1e2   :  { %v2423_v36 = vpop.eup %2422 }
 0x1e3   :  { %151 = vrot.lane.b32.xlu1 %v2423_v36, %s2571_s14 }
 0x255   :  { %v152_v38 = vpop.permute.xlu1 %151 }
 0x256   :  { %v154_v39 = vmul.f32 %v2421_v19, %v152_v38 }
 0x258   :  { %261 = vrot.lane.b32.xlu0 %v154_v39, %s2573_s8  ;;  %156 = vrot.lane.b32.xlu1 %v154_v39, %s2572_s15 }
 0x2ca   :  { %v262_v41 = vpop.permute.xlu0 %261  ;;  %v157_v42 = vpop.permute.xlu1 %156 }
 0x2cb   :  { %v264_v43 = vsel %vm55_vm1, %v1830_v40, %v262_v41  ;;  %v160_v44 = vsel %vm159_vm3, %v157_v42, 0.0 }
 0x2cc   :  { %2022 = vmatmul.mubr.msk.f32.vlgmr.msra.gmra.mrb[0].mxu1 %vm161_vm4, %v160_v44  ;;  %2035 = vmatmul.mubr.msk.f32.vlgmr.msra.gmra.mrb[2].mxu0 %vm57_vm2, %v264_v43 }
 0x2cd   :  { %2285 = vmatpush3.bf16.msra.mxu1 %v2681_v28  ;;  %2297 = vmatpush3.bf16.msra.mxu0 %v2625_v4 }
 0x2ce   :  { %2286 = vmatprep.subr.bf16.mxu1 %v2568_v3  ;;  %2298 = vmatprep.subr.bf16.mxu0 %v2568_v3 }
 0x2cf   :  { %2053 = vmatprep.mubr.msk.f32.mxu1 %vm2569_vm0, %v2570_v6  ;;  %2066 = vmatprep.mubr.msk.f32.mxu0 %vm2569_vm0, %v2570_v6 }
 0x2d1   :  { %2288 = vmatpush3.bf16.msra.mxu1 %v2687_v30  ;;  %2300 = vmatpush3.bf16.msra.mxu0 %v2636_v7 }
 0x2d2   :  { %2289 = vmatprep.subr.bf16.mxu1 %v2568_v3  ;;  %2064 = vmatprep.subr.mxu0 %v2570_v6 }
 0x2d5   :  { %2291 = vmatpush3.bf16.msra.mxu1 %v2697_v33  ;;  %2065 = vmatpush3.msra.mxu0 %v2647_v9 }
 0x2d6   :  { %2292 = vmatprep.subr.bf16.mxu1 %v2568_v3  ;;  %2301 = vmatprep.subr.bf16.mxu0 %v2568_v3 }
 0x2d9   :  { %2294 = vmatpush3.bf16.msra.mxu1 %v2708_v37 }
 0x2da   :  { %2313 = vmatprep.subr.bf16.mxu1 %v2568_v3 }
 0x39f   :  { %v231_v46 = vpop.f32.mrb[0].mxu1  ;;  %v334_v47 = vpop.f32.mrb[2].mxu0 }
 0x3a0   :  { %v232_v48 = vadd.f32 %v2743_v45, %v231_v46  ;;  %v335_v49 = vadd.f32 %v2664_v11, %v334_v47  ;;  %v2023_v50 = vpop.f32.mrb[1].mxu1  ;;  %v2036_v51 = vpop.f32.mrb[3].mxu0 }
 0x3a2   :  { %2424 = vtanh.f32 %v232_v48  ;;  %v1829_v54 = vmul.f32 -1.442695, %v232_v48  ;;  %v1832_v55 = vmul.f32 -1.442695, %v335_v49 }
 0x3a3   :  { %2426 = vtanh.f32 %v335_v49 }
 0x3a4   :  { %2428 = vpow2.f32 %v1829_v54 }
 0x3a5   :  { %2430 = vpow2.f32 %v1832_v55 }
 0x3ac   :  { %v2425_v52 = vpop.eup %2424 }
 0x3ad   :  { %v2427_v53 = vpop.eup %2426  ;;  %244 = vrot.lane.b32.xlu1 %v2425_v52, %s2571_s14 }
 0x3ae   :  { %347 = vrot.lane.b32.xlu0 %v2427_v53, %s2571_s14  ;;  %v2429_v56 = vpop.eup %2428 }
 0x3af   :  { %v2431_v57 = vpop.eup %2430  ;;  %v238_v58 = vadd.f32 1.0, %v2429_v56 }
 0x3b0   :  { %v341_v59 = vadd.f32 1.0, %v2431_v57 }
 0x3b1   :  { %2432 = vrcp.f32 %v238_v58 }
 0x3b2   :  { %2434 = vrcp.f32 %v341_v59 }
 0x3bb   :  { %v2433_v60 = vpop.eup %2432 }
 0x3bc   :  { %v2435_v62 = vpop.eup %2434  ;;  %v242_v2 = vmul.f32 0.0, %v2433_v60 }
 0x3bd   :  { %v345_v8 = vmul.f32 %v2435_v62, %v2669_v24 }
 0x41f   :  { %v245_v61 = vpop.permute.xlu1 %244 }
 0x420   :  { %v247_v63 = vmul.f32 %v2433_v60, %v245_v61  ;;  %v348_v0 = vpop.permute.xlu0 %347 }
 0x421   :  { %v350_v1 = vmul.f32 %v2435_v62, %v348_v0 }
 0x422   :  { %249 = vrot.lane.b32.xlu1 %v247_v63, %s2572_s15 }
 0x423   :  { %352 = vrot.lane.b32.xlu0 %v350_v1, %s2572_s15 }
 0x494   :  { %v250_v5 = vpop.permute.xlu1 %249 }
 0x495   :  { %v2752_v10 = vadd.f32 %v250_v5, %v242_v2  ;;  %v353_v12 = vpop.permute.xlu0 %352  ;;  %v1840_v2 = vld [vmem:[%s3049_s0 + $0x6] sm:$0x3] }
 0x496   :  { %v2754_v13 = vadd.f32 %v353_v12, %v345_v8 }
 0x497   :  { %2436 = vtanh.f32 %v2752_v10 }
 0x498   :  { %2438 = vtanh.f32 %v2754_v13 }
 0x4a1   :  { %v2437_v14 = vpop.eup %2436 }
 0x4a2   :  { %v2439_v15 = vpop.eup %2438  ;;  %255 = vrot.lane.b32.xlu1 %v2437_v14, %s2571_s14 }
 0x4a3   :  { %358 = vrot.lane.b32.xlu0 %v2439_v15, %s2571_s14 }
 0x514   :  { %v256_v16 = vpop.permute.xlu1 %255 }
 0x515   :  { %v258_v17 = vmul.f32 %v2433_v60, %v256_v16  ;;  %v359_v18 = vpop.permute.xlu0 %358 }
 0x516   :  { %v361_v19 = vmul.f32 %v2435_v62, %v359_v18 }
 0x517   :  { %367 = vrot.lane.b32.xlu0 %v258_v17, %s2571_s14 }
 0x518   :  { %363 = vrot.lane.b32.xlu1 %v361_v19, %s2572_s15 }
 0x51c   :  { %470 = vrot.lane.b32.xlu1 %v361_v19, %s2573_s8 }
 0x589   :  { %v368_v20 = vpop.permute.xlu0 %367 }
 0x58a   :  { %v364_v21 = vpop.permute.xlu1 %363 }
 0x58b   :  { %v370_v22 = vsel %vm159_vm3, %v364_v21, %v368_v20 }
 0x58c   :  { %2054 = vmatmul.mubr.msk.f32.vlgmr.msra.gmra.mrb[2].mxu1 %vm161_vm4, %v370_v22 }
 0x58d   :  { %2315 = vmatpush3.bf16.msra.mxu1 %v2625_v4  ;;  %2098 = vmatprep.mubr.msk.f32.mxu1 %vm2569_vm0, %v2570_v6 }
 0x58e   :  { %v471_v24 = vpop.permute.xlu1 %470  ;;  %2316 = vmatprep.subr.bf16.mxu1 %v2568_v3 }
 0x58f   :  { %v473_v25 = vsel %vm55_vm1, %v1835_v23, %v471_v24 }
 0x590   :  { %2067 = vmatmul.mubr.msk.f32.vlgmr.msra.gmra.mrb[4].mxu0 %vm57_vm2, %v473_v25 }
 0x591   :  { %2303 = vmatpush3.bf16.msra.mxu0 %v2681_v28  ;;  %2085 = vmatprep.mubr.msk.f32.mxu0 %vm2569_vm0, %v2570_v6 }
 0x592   :  { %2304 = vmatprep.subr.bf16.mxu0 %v2568_v3  ;;  %2318 = vmatpush3.bf16.msra.mxu1 %v2636_v7 }
 0x593   :  { %2096 = vmatprep.subr.mxu1 %v2570_v6 }
 0x595   :  { %2306 = vmatpush3.bf16.msra.mxu0 %v2687_v30 }
 0x596   :  { %2307 = vmatprep.subr.bf16.mxu0 %v2568_v3  ;;  %2097 = vmatpush3.msra.mxu1 %v2647_v9 }
 0x597   :  { %2319 = vmatprep.subr.bf16.mxu1 %v2568_v3 }
 0x599   :  { %2309 = vmatpush3.bf16.msra.mxu0 %v2697_v33 }
 0x59a   :  { %2310 = vmatprep.subr.bf16.mxu0 %v2568_v3 }
 0x59d   :  { %2312 = vmatpush3.bf16.msra.mxu0 %v2708_v37 }
 0x59e   :  { %2331 = vmatprep.subr.bf16.mxu0 %v2568_v3 }
 0x65f   :  { %v440_v26 = vpop.f32.mrb[2].mxu1 }
 0x660   :  { %v441_v27 = vadd.f32 %v2743_v45, %v440_v26  ;;  %v2055_v29 = vpop.f32.mrb[3].mxu1 }
 0x662   :  { %2440 = vtanh.f32 %v441_v27  ;;  %v1834_v38 = vmul.f32 -1.442695, %v441_v27 }
 0x663   :  { %v543_v31 = vpop.f32.mrb[4].mxu0 }
 0x664   :  { %v544_v32 = vadd.f32 %v2664_v11, %v543_v31  ;;  %v2068_v34 = vpop.f32.mrb[5].mxu0 }
 0x666   :  { %2442 = vtanh.f32 %v544_v32  ;;  %v1837_v39 = vmul.f32 -1.442695, %v544_v32 }
 0x667   :  { %2444 = vpow2.f32 %v1834_v38 }
 0x668   :  { %2446 = vpow2.f32 %v1837_v39 }
 0x66c   :  { %v2441_v35 = vpop.eup %2440 }
 0x66d   :  { %453 = vrot.lane.b32.xlu0 %v2441_v35, %s2571_s14 }
 0x670   :  { %v2443_v36 = vpop.eup %2442 }
 0x671   :  { %556 = vrot.lane.b32.xlu1 %v2443_v36, %s2571_s14  ;;  %v2445_v40 = vpop.eup %2444 }
 0x672   :  { %v447_v41 = vadd.f32 1.0, %v2445_v40  ;;  %v2447_v42 = vpop.eup %2446 }
 0x673   :  { %v550_v43 = vadd.f32 1.0, %v2447_v42 }
 0x674   :  { %2448 = vrcp.f32 %v447_v41 }
 0x675   :  { %2450 = vrcp.f32 %v550_v43 }
 0x67e   :  { %v2449_v44 = vpop.eup %2448 }
 0x67f   :  { %v2451_v48 = vpop.eup %2450  ;;  %v451_v51 = vmul.f32 %v2449_v44, %v2752_v10 }
 0x680   :  { %v554_v54 = vmul.f32 %v2451_v48, %v2754_v13 }
 0x6df   :  { %v454_v46 = vpop.permute.xlu0 %453 }
 0x6e0   :  { %v456_v47 = vmul.f32 %v2449_v44, %v454_v46 }
 0x6e2   :  { %458 = vrot.lane.b32.xlu0 %v456_v47, %s2572_s15 }
 0x6e3   :  { %v557_v49 = vpop.permute.xlu1 %556 }
 0x6e4   :  { %v559_v50 = vmul.f32 %v2451_v48, %v557_v49 }
 0x6e6   :  { %561 = vrot.lane.b32.xlu1 %v559_v50, %s2572_s15 }
 0x754   :  { %v459_v52 = vpop.permute.xlu0 %458 }
 0x755   :  { %v2795_v53 = vadd.f32 %v459_v52, %v451_v51  ;;  %v1845_v51 = vld [vmem:[%s3049_s0 + $0x8] sm:$0x3] }
 0x757   :  { %2452 = vtanh.f32 %v2795_v53 }
 0x758   :  { %v562_v55 = vpop.permute.xlu1 %561 }
 0x759   :  { %v2799_v56 = vadd.f32 %v562_v55, %v554_v54 }
 0x75b   :  { %2454 = vtanh.f32 %v2799_v56 }
 0x761   :  { %v2453_v57 = vpop.eup %2452 }
 0x762   :  { %464 = vrot.lane.b32.xlu0 %v2453_v57, %s2571_s14 }
 0x765   :  { %v2455_v58 = vpop.eup %2454 }
 0x766   :  { %567 = vrot.lane.b32.xlu1 %v2455_v58, %s2571_s14 }
 0x7d4   :  { %v465_v59 = vpop.permute.xlu0 %464 }
 0x7d5   :  { %v467_v60 = vmul.f32 %v2449_v44, %v465_v59 }
 0x7d7   :  { %576 = vrot.lane.b32.xlu1 %v467_v60, %s2571_s14 }
 0x7d8   :  { %v568_v61 = vpop.permute.xlu1 %567 }
 0x7d9   :  { %v570_v62 = vmul.f32 %v2451_v48, %v568_v61 }
 0x7db   :  { %572 = vrot.lane.b32.xlu0 %v570_v62, %s2572_s15 }
 0x7df   :  { %679 = vrot.lane.b32.xlu0 %v570_v62, %s2573_s8 }
 0x849   :  { %v577_v63 = vpop.permute.xlu1 %576 }
 0x84d   :  { %v573_v0 = vpop.permute.xlu0 %572 }
 0x84e   :  { %v579_v1 = vsel %vm159_vm3, %v573_v0, %v577_v63 }
 0x84f   :  { %2086 = vmatmul.mubr.msk.f32.vlgmr.msra.gmra.mrb[6].mxu0 %vm161_vm4, %v579_v1 }
 0x850   :  { %2333 = vmatpush3.bf16.msra.mxu0 %v2625_v4  ;;  %2130 = vmatprep.mubr.msk.f32.mxu0 %vm2569_vm0, %v2570_v6 }
 0x851   :  { %v680_v5 = vpop.permute.xlu0 %679  ;;  %2334 = vmatprep.subr.bf16.mxu0 %v2568_v3 }
 0x852   :  { %v682_v8 = vsel %vm55_vm1, %v1840_v2, %v680_v5 }
 0x853   :  { %2099 = vmatmul.mubr.msk.f32.vlgmr.msra.gmra.mrb[4].mxu1 %vm57_vm2, %v682_v8 }
 0x854   :  { %2321 = vmatpush3.bf16.msra.mxu1 %v2681_v28  ;;  %2117 = vmatprep.mubr.msk.f32.mxu1 %vm2569_vm0, %v2570_v6 }
 0x855   :  { %2322 = vmatprep.subr.bf16.mxu1 %v2568_v3  ;;  %2336 = vmatpush3.bf16.msra.mxu0 %v2636_v7 }
 0x856   :  { %2128 = vmatprep.subr.mxu0 %v2570_v6 }
 0x858   :  { %2324 = vmatpush3.bf16.msra.mxu1 %v2687_v30 }
 0x859   :  { %2325 = vmatprep.subr.bf16.mxu1 %v2568_v3  ;;  %2129 = vmatpush3.msra.mxu0 %v2647_v9 }
 0x85a   :  { %2337 = vmatprep.subr.bf16.mxu0 %v2568_v3 }
 0x85c   :  { %2327 = vmatpush3.bf16.msra.mxu1 %v2697_v33 }
 0x85d   :  { %2328 = vmatprep.subr.bf16.mxu1 %v2568_v3 }
 0x860   :  { %2330 = vmatpush3.bf16.msra.mxu1 %v2708_v37 }
 0x861   :  { %2349 = vmatprep.subr.bf16.mxu1 %v2568_v3 }
 0x922   :  { %v649_v10 = vpop.f32.mrb[6].mxu0 }
 0x923   :  { %v650_v12 = vadd.f32 %v2743_v45, %v649_v10  ;;  %v2087_v13 = vpop.f32.mrb[7].mxu0 }
 0x925   :  { %2456 = vtanh.f32 %v650_v12  ;;  %v1839_v19 = vmul.f32 -1.442695, %v650_v12 }
 0x926   :  { %v752_v14 = vpop.f32.mrb[4].mxu1 }
 0x927   :  { %v753_v15 = vadd.f32 %v2664_v11, %v752_v14  ;;  %v2100_v16 = vpop.f32.mrb[5].mxu1 }
 0x929   :  { %2458 = vtanh.f32 %v753_v15  ;;  %v1842_v20 = vmul.f32 -1.442695, %v753_v15 }
 0x92a   :  { %2460 = vpow2.f32 %v1839_v19 }
 0x92b   :  { %2462 = vpow2.f32 %v1842_v20 }
 0x92f   :  { %v2457_v17 = vpop.eup %2456 }
 0x930   :  { %662 = vrot.lane.b32.xlu1 %v2457_v17, %s2571_s14 }
 0x933   :  { %v2459_v18 = vpop.eup %2458 }
 0x934   :  { %765 = vrot.lane.b32.xlu0 %v2459_v18, %s2571_s14  ;;  %v2461_v21 = vpop.eup %2460 }
 0x935   :  { %v656_v22 = vadd.f32 1.0, %v2461_v21  ;;  %v2463_v23 = vpop.eup %2462 }
 0x936   :  { %v759_v24 = vadd.f32 1.0, %v2463_v23 }
 0x937   :  { %2464 = vrcp.f32 %v656_v22 }
 0x938   :  { %2466 = vrcp.f32 %v759_v24 }
 0x941   :  { %v2465_v25 = vpop.eup %2464 }
 0x942   :  { %v2467_v29 = vpop.eup %2466  ;;  %v660_v34 = vmul.f32 %v2465_v25, %v2795_v53 }
 0x943   :  { %v763_v38 = vmul.f32 %v2467_v29, %v2799_v56 }
 0x9a2   :  { %v663_v26 = vpop.permute.xlu1 %662 }
 0x9a3   :  { %v665_v27 = vmul.f32 %v2465_v25, %v663_v26 }
 0x9a5   :  { %667 = vrot.lane.b32.xlu1 %v665_v27, %s2572_s15 }
 0x9a6   :  { %v766_v31 = vpop.permute.xlu0 %765 }
 0x9a7   :  { %v768_v32 = vmul.f32 %v2467_v29, %v766_v31 }
 0x9a9   :  { %770 = vrot.lane.b32.xlu0 %v768_v32, %s2572_s15 }
 0xa17   :  { %v668_v35 = vpop.permute.xlu1 %667 }
 0xa18   :  { %v2839_v36 = vadd.f32 %v668_v35, %v660_v34  ;;  %v1850_v34 = vld [vmem:[%s3049_s0 + $0xa] sm:$0x3] }
 0xa1a   :  { %2468 = vtanh.f32 %v2839_v36 }
 0xa1b   :  { %v771_v39 = vpop.permute.xlu0 %770 }
 0xa1c   :  { %v2843_v40 = vadd.f32 %v771_v39, %v763_v38 }
 0xa1e   :  { %2470 = vtanh.f32 %v2843_v40 }
 0xa24   :  { %v2469_v41 = vpop.eup %2468 }
 0xa25   :  { %673 = vrot.lane.b32.xlu1 %v2469_v41, %s2571_s14 }
 0xa28   :  { %v2471_v42 = vpop.eup %2470 }
 0xa29   :  { %776 = vrot.lane.b32.xlu0 %v2471_v42, %s2571_s14 }
 0xa97   :  { %v674_v43 = vpop.permute.xlu1 %673 }
 0xa98   :  { %v676_v44 = vmul.f32 %v2465_v25, %v674_v43 }
 0xa9a   :  { %785 = vrot.lane.b32.xlu0 %v676_v44, %s2571_s14 }
 0xa9b   :  { %v777_v46 = vpop.permute.xlu0 %776 }
 0xa9c   :  { %v779_v47 = vmul.f32 %v2467_v29, %v777_v46 }
 0xa9e   :  { %781 = vrot.lane.b32.xlu1 %v779_v47, %s2572_s15 }
 0xaa2   :  { %888 = vrot.lane.b32.xlu1 %v779_v47, %s2573_s8 }
 0xb0c   :  { %v786_v48 = vpop.permute.xlu0 %785 }
 0xb10   :  { %v782_v49 = vpop.permute.xlu1 %781 }
 0xb11   :  { %v788_v50 = vsel %vm159_vm3, %v782_v49, %v786_v48 }
 0xb12   :  { %2118 = vmatmul.mubr.msk.f32.vlgmr.msra.gmra.mrb[6].mxu1 %vm161_vm4, %v788_v50 }
 0xb13   :  { %2351 = vmatpush3.bf16.msra.mxu1 %v2625_v4  ;;  %2162 = vmatprep.mubr.msk.f32.mxu1 %vm2569_vm0, %v2570_v6 }
 0xb14   :  { %v889_v52 = vpop.permute.xlu1 %888  ;;  %2352 = vmatprep.subr.bf16.mxu1 %v2568_v3 }
 0xb15   :  { %v891_v53 = vsel %vm55_vm1, %v1845_v51, %v889_v52 }
 0xb16   :  { %2131 = vmatmul.mubr.msk.f32.vlgmr.msra.gmra.mrb[8].mxu0 %vm57_vm2, %v891_v53 }
 0xb17   :  { %2339 = vmatpush3.bf16.msra.mxu0 %v2681_v28  ;;  %2149 = vmatprep.mubr.msk.f32.mxu0 %vm2569_vm0, %v2570_v6 }
 0xb18   :  { %2340 = vmatprep.subr.bf16.mxu0 %v2568_v3  ;;  %2354 = vmatpush3.bf16.msra.mxu1 %v2636_v7 }
 0xb19   :  { %2160 = vmatprep.subr.mxu1 %v2570_v6 }
 0xb1b   :  { %2342 = vmatpush3.bf16.msra.mxu0 %v2687_v30 }
 0xb1c   :  { %2343 = vmatprep.subr.bf16.mxu0 %v2568_v3  ;;  %2161 = vmatpush3.msra.mxu1 %v2647_v9 }
 0xb1d   :  { %2355 = vmatprep.subr.bf16.mxu1 %v2568_v3 }
 0xb1f   :  { %2345 = vmatpush3.bf16.msra.mxu0 %v2697_v33 }
 0xb20   :  { %2346 = vmatprep.subr.bf16.mxu0 %v2568_v3 }
 0xb23   :  { %2348 = vmatpush3.bf16.msra.mxu0 %v2708_v37 }
 0xb24   :  { %2367 = vmatprep.subr.bf16.mxu0 %v2568_v3 }
 0xbe5   :  { %v858_v54 = vpop.f32.mrb[6].mxu1 }
 0xbe6   :  { %v859_v55 = vadd.f32 %v2743_v45, %v858_v54  ;;  %v2119_v56 = vpop.f32.mrb[7].mxu1 }
 0xbe8   :  { %2472 = vtanh.f32 %v859_v55  ;;  %v1844_v62 = vmul.f32 -1.442695, %v859_v55 }
 0xbe9   :  { %v961_v57 = vpop.f32.mrb[8].mxu0 }
 0xbea   :  { %v962_v58 = vadd.f32 %v2664_v11, %v961_v57  ;;  %v2132_v59 = vpop.f32.mrb[9].mxu0 }
 0xbec   :  { %2474 = vtanh.f32 %v962_v58  ;;  %v1847_v63 = vmul.f32 -1.442695, %v962_v58 }
 0xbed   :  { %2476 = vpow2.f32 %v1844_v62 }
 0xbee   :  { %2478 = vpow2.f32 %v1847_v63 }
 0xbf2   :  { %v2473_v60 = vpop.eup %2472 }
 0xbf3   :  { %871 = vrot.lane.b32.xlu0 %v2473_v60, %s2571_s14 }
 0xbf6   :  { %v2475_v61 = vpop.eup %2474 }
 0xbf7   :  { %974 = vrot.lane.b32.xlu1 %v2475_v61, %s2571_s14  ;;  %v2477_v0 = vpop.eup %2476 }
 0xbf8   :  { %v865_v1 = vadd.f32 1.0, %v2477_v0  ;;  %v2479_v2 = vpop.eup %2478 }
 0xbf9   :  { %v968_v5 = vadd.f32 1.0, %v2479_v2 }
 0xbfa   :  { %2480 = vrcp.f32 %v865_v1 }
 0xbfb   :  { %2482 = vrcp.f32 %v968_v5 }
 0xc04   :  { %v2481_v8 = vpop.eup %2480 }
 0xc05   :  { %v2483_v13 = vpop.eup %2482  ;;  %v869_v16 = vmul.f32 %v2481_v8, %v2839_v36 }
 0xc06   :  { %v972_v19 = vmul.f32 %v2483_v13, %v2843_v40 }
 0xc65   :  { %v872_v10 = vpop.permute.xlu0 %871 }
 0xc66   :  { %v874_v12 = vmul.f32 %v2481_v8, %v872_v10 }
 0xc68   :  { %876 = vrot.lane.b32.xlu0 %v874_v12, %s2572_s15 }
 0xc69   :  { %v975_v14 = vpop.permute.xlu1 %974 }
 0xc6a   :  { %v977_v15 = vmul.f32 %v2483_v13, %v975_v14 }
 0xc6c   :  { %979 = vrot.lane.b32.xlu1 %v977_v15, %s2572_s15 }
 0xcda   :  { %v877_v17 = vpop.permute.xlu0 %876 }
 0xcdb   :  { %v2883_v18 = vadd.f32 %v877_v17, %v869_v16  ;;  %v1855_v16 = vld [vmem:[%s3049_s0 + $0xc] sm:$0x3] }
 0xcdd   :  { %2484 = vtanh.f32 %v2883_v18 }
 0xcde   :  { %v980_v20 = vpop.permute.xlu1 %979 }
 0xcdf   :  { %v2887_v21 = vadd.f32 %v980_v20, %v972_v19 }
 0xce1   :  { %2486 = vtanh.f32 %v2887_v21 }
 0xce7   :  { %v2485_v22 = vpop.eup %2484 }
 0xce8   :  { %882 = vrot.lane.b32.xlu0 %v2485_v22, %s2571_s14 }
 0xceb   :  { %v2487_v23 = vpop.eup %2486 }
 0xcec   :  { %985 = vrot.lane.b32.xlu1 %v2487_v23, %s2571_s14 }
 0xd5a   :  { %v883_v24 = vpop.permute.xlu0 %882 }
 0xd5b   :  { %v885_v25 = vmul.f32 %v2481_v8, %v883_v24 }
 0xd5d   :  { %994 = vrot.lane.b32.xlu1 %v885_v25, %s2571_s14 }
 0xd5e   :  { %v986_v26 = vpop.permute.xlu1 %985 }
 0xd5f   :  { %v988_v27 = vmul.f32 %v2483_v13, %v986_v26 }
 0xd61   :  { %990 = vrot.lane.b32.xlu0 %v988_v27, %s2572_s15 }
 0xd65   :  { %1097 = vrot.lane.b32.xlu0 %v988_v27, %s2573_s8 }
 0xdcf   :  { %v995_v29 = vpop.permute.xlu1 %994 }
 0xdd3   :  { %v991_v31 = vpop.permute.xlu0 %990 }
 0xdd4   :  { %v997_v32 = vsel %vm159_vm3, %v991_v31, %v995_v29 }
 0xdd5   :  { %2150 = vmatmul.mubr.msk.f32.vlgmr.msra.gmra.mrb[10].mxu0 %vm161_vm4, %v997_v32 }
 0xdd6   :  { %2369 = vmatpush3.bf16.msra.mxu0 %v2625_v4  ;;  %2194 = vmatprep.mubr.msk.f32.mxu0 %vm2569_vm0, %v2570_v6 }
 0xdd7   :  { %v1098_v35 = vpop.permute.xlu0 %1097  ;;  %2370 = vmatprep.subr.bf16.mxu0 %v2568_v3 }
 0xdd8   :  { %v1100_v36 = vsel %vm55_vm1, %v1850_v34, %v1098_v35 }
 0xdd9   :  { %2163 = vmatmul.mubr.msk.f32.vlgmr.msra.gmra.mrb[8].mxu1 %vm57_vm2, %v1100_v36 }
 0xdda   :  { %2357 = vmatpush3.bf16.msra.mxu1 %v2681_v28  ;;  %2181 = vmatprep.mubr.msk.f32.mxu1 %vm2569_vm0, %v2570_v6 }
 0xddb   :  { %2358 = vmatprep.subr.bf16.mxu1 %v2568_v3  ;;  %2372 = vmatpush3.bf16.msra.mxu0 %v2636_v7 }
 0xddc   :  { %2192 = vmatprep.subr.mxu0 %v2570_v6 }
 0xdde   :  { %2360 = vmatpush3.bf16.msra.mxu1 %v2687_v30 }
 0xddf   :  { %2361 = vmatprep.subr.bf16.mxu1 %v2568_v3  ;;  %2193 = vmatpush3.msra.mxu0 %v2647_v9 }
 0xde0   :  { %2373 = vmatprep.subr.bf16.mxu0 %v2568_v3 }
 0xde2   :  { %2363 = vmatpush3.bf16.msra.mxu1 %v2697_v33 }
 0xde3   :  { %2364 = vmatprep.subr.bf16.mxu1 %v2568_v3 }
 0xde6   :  { %2366 = vmatpush3.bf16.msra.mxu1 %v2708_v37 }
 0xde7   :  { %2385 = vmatprep.subr.bf16.mxu1 %v2568_v3 }
 0xea8   :  { %v1067_v38 = vpop.f32.mrb[10].mxu0 }
 0xea9   :  { %v1068_v39 = vadd.f32 %v2743_v45, %v1067_v38  ;;  %v2151_v40 = vpop.f32.mrb[11].mxu0 }
 0xeab   :  { %2488 = vtanh.f32 %v1068_v39  ;;  %v1849_v47 = vmul.f32 -1.442695, %v1068_v39 }
 0xeac   :  { %v1170_v41 = vpop.f32.mrb[8].mxu1 }
 0xead   :  { %v1171_v42 = vadd.f32 %v2664_v11, %v1170_v41  ;;  %v2164_v43 = vpop.f32.mrb[9].mxu1 }
 0xeaf   :  { %2490 = vtanh.f32 %v1171_v42  ;;  %v1852_v48 = vmul.f32 -1.442695, %v1171_v42 }
 0xeb0   :  { %2492 = vpow2.f32 %v1849_v47 }
 0xeb1   :  { %2494 = vpow2.f32 %v1852_v48 }
 0xeb5   :  { %v2489_v44 = vpop.eup %2488 }
 0xeb6   :  { %1080 = vrot.lane.b32.xlu1 %v2489_v44, %s2571_s14 }
 0xeb9   :  { %v2491_v46 = vpop.eup %2490 }
 0xeba   :  { %1183 = vrot.lane.b32.xlu0 %v2491_v46, %s2571_s14  ;;  %v2493_v49 = vpop.eup %2492 }
 0xebb   :  { %v1074_v50 = vadd.f32 1.0, %v2493_v49  ;;  %v2495_v51 = vpop.eup %2494 }
 0xebc   :  { %v1177_v52 = vadd.f32 1.0, %v2495_v51 }
 0xebd   :  { %2496 = vrcp.f32 %v1074_v50 }
 0xebe   :  { %2498 = vrcp.f32 %v1177_v52 }
 0xec7   :  { %v2497_v53 = vpop.eup %2496 }
 0xec8   :  { %v2499_v56 = vpop.eup %2498  ;;  %v1078_v59 = vmul.f32 %v2497_v53, %v2883_v18 }
 0xec9   :  { %v1181_v62 = vmul.f32 %v2499_v56, %v2887_v21 }
 0xf28   :  { %v1081_v54 = vpop.permute.xlu1 %1080 }
 0xf29   :  { %v1083_v55 = vmul.f32 %v2497_v53, %v1081_v54 }
 0xf2b   :  { %1085 = vrot.lane.b32.xlu1 %v1083_v55, %s2572_s15 }
 0xf2c   :  { %v1184_v57 = vpop.permute.xlu0 %1183 }
 0xf2d   :  { %v1186_v58 = vmul.f32 %v2499_v56, %v1184_v57 }
 0xf2f   :  { %1188 = vrot.lane.b32.xlu0 %v1186_v58, %s2572_s15 }
 0xf9d   :  { %v1086_v60 = vpop.permute.xlu1 %1085 }
 0xf9e   :  { %v2927_v61 = vadd.f32 %v1086_v60, %v1078_v59 }
 0xfa0   :  { %2500 = vtanh.f32 %v2927_v61 }
 0xfa1   :  { %v1189_v63 = vpop.permute.xlu0 %1188 }
 0xfa2   :  { %v2931_v0 = vadd.f32 %v1189_v63, %v1181_v62 }
 0xfa4   :  { %2502 = vtanh.f32 %v2931_v0 }
 0xfaa   :  { %v2501_v1 = vpop.eup %2500 }
 0xfab   :  { %1091 = vrot.lane.b32.xlu1 %v2501_v1, %s2571_s14 }
 0xfae   :  { %v2503_v2 = vpop.eup %2502 }
 0xfaf   :  { %1194 = vrot.lane.b32.xlu0 %v2503_v2, %s2571_s14 }
0x101d   :  { %v1092_v5 = vpop.permute.xlu1 %1091 }
0x101e   :  { %v1094_v8 = vmul.f32 %v2497_v53, %v1092_v5 }
0x1020   :  { %1203 = vrot.lane.b32.xlu0 %v1094_v8, %s2571_s14 }
0x1021   :  { %v1195_v10 = vpop.permute.xlu0 %1194 }
0x1022   :  { %v1197_v12 = vmul.f32 %v2499_v56, %v1195_v10  ;;  %v1860_v56 = vld [vmem:[%s3049_s0 + $0xe] sm:$0x3] }
0x1024   :  { %1199 = vrot.lane.b32.xlu1 %v1197_v12, %s2572_s15 }
0x1028   :  { %1306 = vrot.lane.b32.xlu1 %v1197_v12, %s2573_s8 }
0x1092   :  { %v1204_v13 = vpop.permute.xlu0 %1203 }
0x1096   :  { %v1200_v14 = vpop.permute.xlu1 %1199 }
0x1097   :  { %v1206_v15 = vsel %vm159_vm3, %v1200_v14, %v1204_v13 }
0x1098   :  { %2182 = vmatmul.mubr.msk.f32.vlgmr.msra.gmra.mrb[10].mxu1 %vm161_vm4, %v1206_v15 }
0x1099   :  { %2387 = vmatpush3.bf16.msra.mxu1 %v2625_v4  ;;  %2226 = vmatprep.mubr.msk.f32.mxu1 %vm2569_vm0, %v2570_v6 }
0x109a   :  { %v1307_v17 = vpop.permute.xlu1 %1306  ;;  %2388 = vmatprep.subr.bf16.mxu1 %v2568_v3 }
0x109b   :  { %v1309_v18 = vsel %vm55_vm1, %v1855_v16, %v1307_v17 }
0x109c   :  { %2195 = vmatmul.mubr.msk.f32.vlgmr.msra.gmra.mrb[12].mxu0 %vm57_vm2, %v1309_v18 }
0x109d   :  { %2375 = vmatpush3.bf16.msra.mxu0 %v2681_v28  ;;  %2213 = vmatprep.mubr.msk.f32.mxu0 %vm2569_vm0, %v2570_v6 }
0x109e   :  { %2376 = vmatprep.subr.bf16.mxu0 %v2568_v3  ;;  %2390 = vmatpush3.bf16.msra.mxu1 %v2636_v7 }
0x109f   :  { %2224 = vmatprep.subr.mxu1 %v2570_v6 }
0x10a1   :  { %2378 = vmatpush3.bf16.msra.mxu0 %v2687_v30 }
0x10a2   :  { %2379 = vmatprep.subr.bf16.mxu0 %v2568_v3  ;;  %2225 = vmatpush3.msra.mxu1 %v2647_v9 }
0x10a3   :  { %2391 = vmatprep.subr.bf16.mxu1 %v2568_v3 }
0x10a5   :  { %2381 = vmatpush3.bf16.msra.mxu0 %v2697_v33 }
0x10a6   :  { %2382 = vmatprep.subr.bf16.mxu0 %v2568_v3 }
0x10a9   :  { %2384 = vmatpush3.bf16.msra.mxu0 %v2708_v37 }
0x10aa   :  { %2403 = vmatprep.subr.bf16.mxu0 %v2568_v3 }
0x116b   :  { %v1276_v4 = vpop.f32.mrb[10].mxu1 }
0x116c   :  { %v1277_v7 = vadd.f32 %v2743_v45, %v1276_v4  ;;  %v2183_v19 = vpop.f32.mrb[11].mxu1 }
0x116e   :  { %2504 = vtanh.f32 %v1277_v7  ;;  %v1854_v24 = vmul.f32 -1.442695, %v1277_v7 }
0x116f   :  { %v1379_v20 = vpop.f32.mrb[12].mxu0 }
0x1170   :  { %v1380_v21 = vadd.f32 %v2664_v11, %v1379_v20  ;;  %v2196_v22 = vpop.f32.mrb[13].mxu0 }
0x1172   :  { %2506 = vtanh.f32 %v1380_v21  ;;  %v1857_v25 = vmul.f32 -1.442695, %v1380_v21 }
0x1173   :  { %2508 = vpow2.f32 %v1854_v24 }
0x1174   :  { %2510 = vpow2.f32 %v1857_v25 }
0x1178   :  { %v2505_v9 = vpop.eup %2504 }
0x1179   :  { %1289 = vrot.lane.b32.xlu0 %v2505_v9, %s2571_s14 }
0x117c   :  { %v2507_v23 = vpop.eup %2506 }
0x117d   :  { %1392 = vrot.lane.b32.xlu1 %v2507_v23, %s2571_s14  ;;  %v2509_v26 = vpop.eup %2508 }
0x117e   :  { %v1283_v27 = vadd.f32 1.0, %v2509_v26  ;;  %v2511_v29 = vpop.eup %2510 }
0x117f   :  { %v1386_v31 = vadd.f32 1.0, %v2511_v29 }
0x1180   :  { %2512 = vrcp.f32 %v1283_v27 }
0x1181   :  { %2514 = vrcp.f32 %v1386_v31 }
0x118a   :  { %v2513_v32 = vpop.eup %2512 }
0x118b   :  { %v2515_v36 = vpop.eup %2514  ;;  %v1287_v40 = vmul.f32 %v2513_v32, %v2927_v61 }
0x118c   :  { %v1390_v43 = vmul.f32 %v2515_v36, %v2931_v0 }
0x11eb   :  { %v1290_v34 = vpop.permute.xlu0 %1289 }
0x11ec   :  { %v1292_v35 = vmul.f32 %v2513_v32, %v1290_v34 }
0x11ee   :  { %1294 = vrot.lane.b32.xlu0 %v1292_v35, %s2572_s15 }
0x11ef   :  { %v1393_v38 = vpop.permute.xlu1 %1392 }
0x11f0   :  { %v1395_v39 = vmul.f32 %v2515_v36, %v1393_v38 }
0x11f2   :  { %1397 = vrot.lane.b32.xlu1 %v1395_v39, %s2572_s15 }
0x1260   :  { %v1295_v41 = vpop.permute.xlu0 %1294 }
0x1261   :  { %v2971_v42 = vadd.f32 %v1295_v41, %v1287_v40 }
0x1263   :  { %2516 = vtanh.f32 %v2971_v42 }
0x1264   :  { %v1398_v44 = vpop.permute.xlu1 %1397 }
0x1265   :  { %v2975_v46 = vadd.f32 %v1398_v44, %v1390_v43  ;;  %v1723_v44 = vld [vmem:[%s3054_s5 + $0x8] sm:$0xff] }
0x1267   :  { %2518 = vtanh.f32 %v2975_v46 }
0x126d   :  { %v2517_v47 = vpop.eup %2516 }
0x126e   :  { %1300 = vrot.lane.b32.xlu0 %v2517_v47, %s2571_s14 }
0x1271   :  { %v2519_v48 = vpop.eup %2518 }
0x1272   :  { %1403 = vrot.lane.b32.xlu1 %v2519_v48, %s2571_s14  ;;  %v1725_v48 = vld [vmem:[%s3054_s5 + $0x18] sm:$0xff] }
0x12e0   :  { %v1301_v49 = vpop.permute.xlu0 %1300 }
0x12e1   :  { %v1303_v50 = vmul.f32 %v2513_v32, %v1301_v49 }
0x12e3   :  { %1412 = vrot.lane.b32.xlu1 %v1303_v50, %s2571_s14 }
0x12e4   :  { %v1404_v51 = vpop.permute.xlu1 %1403 }
0x12e5   :  { %v1406_v52 = vmul.f32 %v2515_v36, %v1404_v51 }
0x12e7   :  { %1408 = vrot.lane.b32.xlu0 %v1406_v52, %s2572_s15 }
0x12eb   :  { %1515 = vrot.lane.b32.xlu0 %v1406_v52, %s2573_s8 }
0x1355   :  { %v1413_v53 = vpop.permute.xlu1 %1412 }
0x1359   :  { %v1409_v54 = vpop.permute.xlu0 %1408 }
0x135a   :  { %v1415_v55 = vsel %vm159_vm3, %v1409_v54, %v1413_v53  ;;  %v1865_v54 = vld [vmem:[%s3055_s6] ss:$0 sm:$0xff] }
0x135b   :  { %2214 = vmatmul.mubr.msk.f32.vlgmr.msra.gmra.mrb[14].mxu0 %vm161_vm4, %v1415_v55 }
0x135c   :  { %2256 = vmatprep.mubr.msk.f32.mxu0 %vm2569_vm0, %v2570_v6 }
0x135d   :  { %v1516_v57 = vpop.permute.xlu0 %1515 }
0x135e   :  { %v1518_v58 = vsel %vm55_vm1, %v1860_v56, %v1516_v57 }
0x135f   :  { %2227 = vmatmul.mubr.msk.f32.vlgmr.msra.gmra.mrb[12].mxu1 %vm57_vm2, %v1518_v58 }
0x1360   :  { %2393 = vmatpush3.bf16.msra.mxu1 %v2681_v28  ;;  %2245 = vmatprep.mubr.msk.f32.mxu1 %vm2569_vm0, %v2570_v6 }
0x1361   :  { %2394 = vmatprep.subr.bf16.mxu1 %v2568_v3 }
0x1364   :  { %2396 = vmatpush3.bf16.msra.mxu1 %v2687_v30 }
0x1365   :  { %2397 = vmatprep.subr.bf16.mxu1 %v2568_v3 }
0x1368   :  { %2399 = vmatpush3.bf16.msra.mxu1 %v2697_v33 }
0x1369   :  { %2400 = vmatprep.subr.bf16.mxu1 %v2568_v3 }
0x136c   :  { %2402 = vmatpush3.bf16.msra.mxu1 %v2708_v37 }
0x142e   :  { %v1485_v59 = vpop.f32.mrb[14].mxu0 }
0x142f   :  { %v1486_v60 = vadd.f32 %v2743_v45, %v1485_v59  ;;  %v2215_v61 = vpop.f32.mrb[15].mxu0 }
0x1431   :  { %2520 = vtanh.f32 %v1486_v60  ;;  %v1859_v33 = vmul.f32 -1.442695, %v1486_v60 }
0x1432   :  { %v1588_v28 = vpop.f32.mrb[12].mxu1 }
0x1433   :  { %v1589_v6 = vadd.f32 %v2664_v11, %v1588_v28  ;;  %v2228_v62 = vpop.f32.mrb[13].mxu1 }
0x1435   :  { %2522 = vtanh.f32 %v1589_v6  ;;  %v1862_v0 = vmul.f32 -1.442695, %v1589_v6 }
0x1436   :  { %2524 = vpow2.f32 %v1859_v33 }
0x1437   :  { %2526 = vpow2.f32 %v1862_v0 }
0x143b   :  { %v2521_v63 = vpop.eup %2520 }
0x143c   :  { %1498 = vrot.lane.b32.xlu1 %v2521_v63, %s2571_s14 }
0x143f   :  { %v2523_v30 = vpop.eup %2522 }
0x1440   :  { %1601 = vrot.lane.b32.xlu0 %v2523_v30, %s2571_s14  ;;  %v2525_v37 = vpop.eup %2524 }
0x1441   :  { %v1492_v1 = vadd.f32 1.0, %v2525_v37  ;;  %v2527_v2 = vpop.eup %2526 }
0x1442   :  { %v1595_v5 = vadd.f32 1.0, %v2527_v2 }
0x1443   :  { %2528 = vrcp.f32 %v1492_v1 }
0x1444   :  { %2530 = vrcp.f32 %v1595_v5 }
0x144d   :  { %v2529_v8 = vpop.eup %2528 }
0x144e   :  { %v2531_v12 = vpop.eup %2530  ;;  %v1496_v15 = vmul.f32 %v2529_v8, %v2971_v42 }
0x144f   :  { %v1599_v18 = vmul.f32 %v2531_v12, %v2975_v46  ;;  %v1724_v46 = vld [vmem:[%s3054_s5 + $0x10] sm:$0xff] }
0x1450   :  { %v2407_v49 = vpack.c.bf16 %v1725_v48, %v1724_v46 }
0x14ae   :  { %v1499_v11 = vpop.permute.xlu1 %1498 }
0x14af   :  { %v1501_v10 = vmul.f32 %v2529_v8, %v1499_v11 }
0x14b1   :  { %1503 = vrot.lane.b32.xlu1 %v1501_v10, %s2572_s15 }
0x14b2   :  { %v1602_v13 = vpop.permute.xlu0 %1601 }
0x14b3   :  { %v1604_v14 = vmul.f32 %v2531_v12, %v1602_v13 }
0x14b5   :  { %1606 = vrot.lane.b32.xlu0 %v1604_v14, %s2572_s15 }
0x1523   :  { %v1504_v16 = vpop.permute.xlu1 %1503 }
0x1524   :  { %v1506_v17 = vadd.f32 %v1504_v16, %v1496_v15 }
0x1526   :  { %2532 = vtanh.f32 %v1506_v17 }
0x1527   :  { %v1607_v4 = vpop.permute.xlu0 %1606 }
0x1528   :  { %v1609_v7 = vadd.f32 %v1607_v4, %v1599_v18 }
0x152a   :  { %2534 = vtanh.f32 %v1609_v7 }
0x1530   :  { %v2533_v19 = vpop.eup %2532 }
0x1531   :  { %1509 = vrot.lane.b32.xlu1 %v2533_v19, %s2571_s14 }
0x1534   :  { %v2535_v20 = vpop.eup %2534 }
0x1535   :  { %1612 = vrot.lane.b32.xlu0 %v2535_v20, %s2571_s14 }
0x15a3   :  { %v1510_v21 = vpop.permute.xlu1 %1509 }
0x15a4   :  { %v1512_v22 = vmul.f32 %v2529_v8, %v1510_v21 }
0x15a6   :  { %1621 = vrot.lane.b32.xlu0 %v1512_v22, %s2571_s14 }
0x15a7   :  { %v1613_v9 = vpop.permute.xlu0 %1612 }
0x15a8   :  { %v1615_v23 = vmul.f32 %v2531_v12, %v1613_v9 }
0x15aa   :  { %1617 = vrot.lane.b32.xlu1 %v1615_v23, %s2572_s15 }
0x1618   :  { %v1622_v24 = vpop.permute.xlu0 %1621 }
0x161c   :  { %v1618_v25 = vpop.permute.xlu1 %1617 }
0x161d   :  { %v1624_v26 = vsel %vm159_vm3, %v1618_v25, %v1622_v24 }
0x161e   :  { %2246 = vmatmul.mubr.msk.f32.vlgmr.msra.gmra.mrb[14].mxu1 %vm161_vm4, %v1624_v26 }
0x16f1   :  { %v1694_v27 = vpop.f32.mrb[14].mxu1 }
0x16f2   :  { %v1695_v29 = vadd.f32 %v2743_v45, %v1694_v27  ;;  %v2247_v31 = vpop.f32.mrb[15].mxu1  ;;  %v1722_v45 = vld [vmem:[%s3054_s5] sm:$0xff]  ;;  %s2574_s5 = smov [#allocation2]  }
0x16f3   :  { %v2404_v47 = vpack.c.bf16 %v1723_v44, %v1722_v45  ;;  %s1816_s3 = sshll.u32 %s2574_s5, 4  ;;  %s1817_s3 = int_to_ptr.vmem [resolvable:$true] %s1816_s3 }
0x16f4   :  { %2536 = vtanh.f32 %v1695_v29  ;;  %v1864_v34 = vmul.f32 -1.442695, %v1695_v29  ;;  %p2549_p1 = scmp.lt.s32.totalorder %s1817_s3, %s1817_s3 }
0x16f5   :  { %2405 = vmatpush3.bf16.msra.mxu0 %v2404_v47 }
0x16f6   :  { %2538 = vpow2.f32 %v1864_v34  ;;  %2406 = vmatprep.subr.bf16.mxu0 %v2568_v3 }
0x16f9   :  { %2408 = vmatpush3.bf16.msra.mxu0 %v2407_v49 }
0x16fe   :  { %v2537_v32 = vpop.eup %2536 }
0x16ff   :  { %1707 = vrot.lane.b32.xlu1 %v2537_v32, %s2571_s14 }
0x1700   :  { %v2539_v35 = vpop.eup %2538 }
0x1701   :  { %v1701_v36 = vadd.f32 1.0, %v2539_v35 }
0x1703   :  { %2540 = vrcp.f32 %v1701_v36 }
0x170d   :  { %v2541_v38 = vpop.eup %2540 }
0x170e   :  { %v1705_v41 = vmul.f32 %v2541_v38, %v1506_v17 }
0x1771   :  { %v1708_v39 = vpop.permute.xlu1 %1707 }
0x1772   :  { %v1710_v40 = vmul.f32 %v2541_v38, %v1708_v39 }
0x1774   :  { %1712 = vrot.lane.b32.xlu0 %v1710_v40, %s2572_s15 }
0x17e6   :  { %v1713_v42 = vpop.permute.xlu0 %1712 }
0x17e7   :  { %v1715_v43 = vadd.f32 %v1713_v42, %v1705_v41 }
0x17e9   :  { %2542 = vtanh.f32 %v1715_v43 }
0x17f3   :  { %v2543_v50 = vpop.eup %2542 }
0x17f4   :  { %1718 = vrot.lane.b32.xlu1 %v2543_v50, %s2571_s14  ;;  %s2544_s14 = scalar_lea.vmem %s1817_s3, 32 }
0x17f5   :  { %p2545_p0 = scmp.ne.s32.totalorder %s1817_s3, %s2544_s14  ;;  %p2550_p2 = scmp.lt.s32.totalorder %s2544_s14, %s2544_s14 }
0x17f7   :  { %p2551_p3 = por %p2550_p2, %p2549_p1 }
0x17f9   :  { %p2552_p4 = pnand %p2551_p3, %p2545_p0 }
0x1866   :  { %v1719_v51 = vpop.permute.xlu1 %1718 }
0x1867   :  { %v1721_v52 = vmul.f32 %v2541_v38, %v1719_v51 }
0x1869   :  { %1734 = vrot.lane.b32.xlu0 %v1721_v52, %s2572_s15 }
0x18db   :  { %v1735_v53 = vpop.permute.xlu0 %1734 }
0x18dc   :  { %2257 = vmatmul.mubr.msk.f32.vlgmr.msra.gmra.mrb[16].mxu0 %vm159_vm3, %v1735_v53 }
0x19af   :  { %v1804_v55 = vpop.f32.mrb[16].mxu0 }
0x19b0   :  { %v1805_v3 = vadd.f32 %v1865_v54, %v1804_v55  ;;  %v2258_v56 = vpop.f32.mrb[17].mxu0 }
0x19b2   :  { %1809 = vst.msk [vmem:[#allocation2] sm:$0x3] %vm1808_vm5, %v1805_v3 }
0x19b3   :  { %2555 = shalt.err (!%p2552_p4)
}
0x19b4   :  { %s2556_s10 = scalar_lea.hbm %s3056_s7, 32 }
0x19b5   :  { %p2557_p5 = scmp.ne.s32.totalorder %s3056_s7, %s2556_s10  ;;  %p2560_p6 = scmp.lt.u32.totalorder %s2556_s10, %s3056_s7 }
0x19b7   :  { %p2562_p7 = pnand %p2560_p6, %p2557_p5 }
0x19b9   :  { %2565 = shalt.err (!%p2562_p7)
}
0x19ba   :  { %1819 = dma.vmem_to_hbm [thread:$0]  %s1817_s3, 32, %s3056_s7, [#allocation3]  }
0x19bb   :  { %2566 = dma.done.wait [#allocation3], 32  }
0x19bc   :  { %2567 = vsyncadd [#allocation3], 4294967264 }
0x19bd   :  { %1823 = vsyncpa [#allocation3], 1 }

</bundles_post_ra>
